<compile_context>
chip_gen: v7x
topology: tpu7x:2x2x1
jax: 0.10.0
libtpu: 0.0.40
codegen_flags: <defaults>
</compile_context>

<pallas_src>
from functools import partial

import jax
import jax.numpy as jnp
from jax import lax
from jax.experimental import pallas as pl
from jax.experimental.pallas import tpu as pltpu


HEADS = 4
DIM_HEAD = 32


def linear_attention_kernel(x_ref, w_qkv_ref, w_out_ref, b_out_ref,
                            gamma_ref, beta_ref, mask_ref, o_ref,
                            *, heads, dim_head, scale, use_bf16_exp):
    hidden = heads * dim_head
    b_tile = x_ref.shape[0]
    n = x_ref.shape[-1]

    w_qkv = w_qkv_ref[...]            # (3*hidden, C)     bf16
    w_out = w_out_ref[...]            # (C, hidden)       bf16
    mask = mask_ref[...]              # (hidden, hidden)  bf16 block-diagonal head mask
    b_out = b_out_ref[...]            # (C, 1) f32
    gamma = gamma_ref[...]            # (C, 1) f32
    beta = beta_ref[...]              # (C, 1) f32

    exp_dtype = jnp.bfloat16 if use_bf16_exp else jnp.float32

    # Static (small) batch tile: fully unrolled, iterations are independent.
    for i in range(b_tile):
        x = x_ref[i]                  # (C, N) bf16

        # to_qkv 1x1 conv (no bias): three skinny MXU matmuls so each f32 slab dies
        # as soon as it is consumed (v never lives as f32).
        q = jnp.dot(w_qkv[0:hidden, :], x,
                    preferred_element_type=jnp.float32)                # (hidden, N) f32
        k = jnp.dot(w_qkv[hidden:2 * hidden, :], x,
                    preferred_element_type=jnp.float32)                # (hidden, N) f32
        v_b = jnp.dot(w_qkv[2 * hidden:3 * hidden, :], x,
                      preferred_element_type=jnp.float32).astype(jnp.bfloat16)

        # q softmax over dim_head (per-head 32-row sublane block), fused with *scale.
        q3 = q.reshape(heads, dim_head, n)                             # (H, D, N)
        q_m = jnp.max(q3, axis=1, keepdims=True)                       # (H, 1, N) f32
        q_e = jnp.exp((q3 - q_m).astype(exp_dtype))                    # (H, D, N)
        q_sum = jnp.sum(q_e.astype(jnp.float32), axis=1, keepdims=True)
        q_fac = pl.reciprocal(q_sum, approx=True) * scale              # (H, 1, N) f32
        q_s = (q_e * q_fac.astype(exp_dtype)).astype(jnp.bfloat16).reshape(hidden, n)

        # k softmax over the spatial axis N (lane axis).
        k_m = jnp.max(k, axis=-1, keepdims=True)                       # (hidden, 1) f32
        k_e = jnp.exp((k - k_m).astype(exp_dtype))                     # (hidden, N)
        k_sum = jnp.sum(k_e.astype(jnp.float32), axis=-1, keepdims=True)
        k_fac = pl.reciprocal(k_sum, approx=True)                      # (hidden, 1) f32
        k_s = (k_e * k_fac.astype(exp_dtype)).astype(jnp.bfloat16)     # (hidden, N) bf16

        # Fused-heads context: ctx[d, e] = sum_n k_s[d, n] * v[e, n] -> (128, 128);
        # the precomputed block-diagonal mask keeps only within-head (d, e) pairs.
        ctx = lax.dot_general(k_s, v_b, (((1,), (1,)), ((), ())),
                              preferred_element_type=jnp.float32)      # (hidden, hidden)
        ctx_bd = ctx.astype(jnp.bfloat16) * mask                       # (hidden, hidden)

        # w_out folded into the context:  y = (w_out @ ctx_bd^T) @ q_s + b_out
        w_eff = lax.dot_general(w_out, ctx_bd, (((1,), (1,)), ((), ())),
                                preferred_element_type=jnp.float32)    # (C, hidden)
        y = jnp.dot(w_eff.astype(jnp.bfloat16), q_s,
                    preferred_element_type=jnp.float32) + b_out        # (C, N) f32

        # to_out[1]: GroupNorm(1, dim) over the whole (C, N) slab; two-pass
        # (centered) variance avoids E[y^2]-mean^2 cancellation.
        cnt = y.shape[0] * y.shape[1]
        mean = jnp.sum(y) / cnt
        y_c = y - mean
        var = jnp.sum(y_c * y_c) / cnt
        y_n = y_c * lax.rsqrt(var + 1e-5)
        o_ref[i] = (y_n * gamma + beta).astype(o_ref.dtype)


def _pick_batch_tile(b, n, hidden):
    """Batch elements per grid step.

    Amortizes the ~0.35 us per-grid-step overhead while (a) keeping >= 2 grid steps
    whenever b >= 2 so both v7x TensorCores get work, and (b) keeping the unrolled
    tile's live intermediates (~24*hidden*n bytes per element) well inside VMEM.
    """
    per_elem = 24 * hidden * n
    cap = max(1, min(8, b // 2 if b >= 2 else 1, (24 << 20) // max(per_elem, 1)))
    for t in range(cap, 0, -1):
        if b % t == 0:
            return t
    return 1


def linear_attention(x_nchw, w_qkv, w_out, b_out, gamma, beta,
                     *, heads=HEADS, dim_head=DIM_HEAD, out_dtype=jnp.bfloat16):
    b, c, h, w = x_nchw.shape
    n = h * w
    hidden = heads * dim_head
    scale = dim_head ** -0.5
    b_tile = _pick_batch_tile(b, n, hidden)
    grid = (b // b_tile,)

    # NCHW -> (B, C, N): pure reshape, no transpose. bf16 activations/weights for the
    # MXU and halved HBM traffic; all accumulation stays f32 inside the kernel.
    x = x_nchw.reshape(b, c, n).astype(jnp.bfloat16)
    w_qkv_b = w_qkv.astype(jnp.bfloat16)     # (3*hidden, C)
    w_out_b = w_out.astype(jnp.bfloat16)     # (C, hidden)
    b_out_f = b_out.astype(jnp.float32)      # (C, 1)
    gamma_f = gamma.astype(jnp.float32)      # (C, 1)
    beta_f = beta.astype(jnp.float32)        # (C, 1)

    # Precomputed block-diagonal head mask: replaces in-kernel 128x128 iota/cmp/select.
    head_id = jnp.arange(hidden, dtype=jnp.int32) // dim_head
    mask = (head_id[:, None] == head_id[None, :]).astype(jnp.bfloat16)

    # bf16 exps only on chips with a bf16 EUP (v6e / v7x); keep f32 on v5e and older.
    kind = jax.devices()[0].device_kind.lower()
    use_bf16_exp = not any(t in kind for t in ("v2", "v3", "v4", "v5"))

    kernel = partial(linear_attention_kernel, heads=heads, dim_head=dim_head,
                     scale=scale, use_bf16_exp=use_bf16_exp)

    # Advisory cost estimate (post w_out-fusion FLOP count).
    flops = int(b * (2 * 3 * hidden * c * n            # to_qkv
                     + 2 * hidden * hidden * n         # fused-head context
                     + 2 * c * hidden * hidden         # w_out @ ctx_bd^T
                     + 2 * c * hidden * n))            # (w_out @ ctx_bd^T) @ q_s
    transcendentals = int(b * 2 * hidden * n)          # the two exps
    out_itemsize = jnp.dtype(out_dtype).itemsize
    bytes_accessed = int(x.size * 2 + b * c * n * out_itemsize
                         + (w_qkv_b.size + w_out_b.size + mask.size) * 2
                         + (b_out_f.size + gamma_f.size + beta_f.size) * 4)

    # Scoped-VMEM request: double-buffered blocks + weights + live intermediates with
    # a 1.5x safety factor for compiler temporaries; floor 32 MiB, cap 48 MiB so there
    # is headroom on v7x's 64 MiB-per-TC VMEM.
    bytes_blocks = 2 * b_tile * c * n * (2 + out_itemsize)
    bytes_weights = 2 * ((3 * hidden * c + c * hidden + hidden * hidden) * 2 + 3 * c * 4)
    bytes_interm = int(1.5 * b_tile * 24 * hidden * n) + 8 * hidden * hidden
    vmem_est = bytes_blocks + bytes_weights + bytes_interm + (8 << 20)
    vmem_limit = int(min(max(vmem_est, 32 << 20), 48 << 20))

    out = pl.pallas_call(
        kernel,
        out_shape=jax.ShapeDtypeStruct((b, c, n), out_dtype),
        grid_spec=pltpu.PrefetchScalarGridSpec(
            num_scalar_prefetch=0,
            grid=grid,
            in_specs=[
                pl.BlockSpec((b_tile, c, n), lambda i: (i, 0, 0)),       # x (B_TILE, C, N)
                pl.BlockSpec((3 * hidden, c), lambda i: (0, 0)),         # w_qkv
                pl.BlockSpec((c, hidden), lambda i: (0, 0)),             # w_out
                pl.BlockSpec((c, 1), lambda i: (0, 0)),                  # conv bias
                pl.BlockSpec((c, 1), lambda i: (0, 0)),                  # GN gamma
                pl.BlockSpec((c, 1), lambda i: (0, 0)),                  # GN beta
                pl.BlockSpec((hidden, hidden), lambda i: (0, 0)),        # head mask
            ],
            out_specs=pl.BlockSpec((b_tile, c, n), lambda i: (i, 0, 0)),  # lane-dense
        ),
        compiler_params=pltpu.CompilerParams(
            dimension_semantics=("parallel",),
            vmem_limit_bytes=vmem_limit),
        cost_estimate=pl.CostEstimate(flops=flops,
                                      transcendentals=transcendentals,
                                      bytes_accessed=bytes_accessed),
    )(x, w_qkv_b, w_out_b, b_out_f, gamma_f, beta_f, mask)

    # (B, C, N) -> NCHW: pure reshape, no transpose.
    return out.reshape(b, c, h, w)


def linear_attention_ref(x_nchw, w_qkv, w_out, b_out, gamma, beta,
                         *, heads=HEADS, dim_head=DIM_HEAD):
    """Pure-JAX f32 reference mirroring the PyTorch forward."""
    b, c, h, w = x_nchw.shape
    n = h * w
    hidden = heads * dim_head
    scale = dim_head ** -0.5
    x = x_nchw.reshape(b, c, n)                                    # (b, c, n)
    qkv = jnp.einsum('oc,bcn->bon', w_qkv, x)                      # (b, 3*hidden, n)
    q, k, v = jnp.split(qkv, 3, axis=1)

    def to_heads(t):                                               # (b, hidden, n) -> (b,H,D,n)
        return t.reshape(b, heads, dim_head, n)

    q, k, v = map(to_heads, (q, k, v))
    q = jax.nn.softmax(q, axis=-2) * scale
    k = jax.nn.softmax(k, axis=-1)
    context = jnp.einsum('bhdn,bhen->bhde', k, v)
    out = jnp.einsum('bhde,bhdn->bhen', context, q)                # (b, H, D, n)
    out = out.reshape(b, hidden, n)
    y = jnp.einsum('ch,bhn->bcn', w_out, out) + b_out[None]        # (b, c, n)
    mean = jnp.mean(y, axis=(1, 2), keepdims=True)
    var = jnp.mean((y - mean) ** 2, axis=(1, 2), keepdims=True)
    y = (y - mean) / jnp.sqrt(var + 1e-5) * gamma[None] + beta[None]
    return y.reshape(b, c, h, w)


if __name__ == "__main__":
    B, DIM, H, W = 2, 4, 16, 16
    HIDDEN = HEADS * DIM_HEAD

    key = jax.random.PRNGKey(0)
    k_x, k_qkv, k_wout, k_bout, k_g, k_b = jax.random.split(key, 6)

    x = jax.random.normal(k_x, (B, DIM, H, W), jnp.float32)
    # to_qkv: Conv2d(dim, hidden*3, 1, bias=False) weight in (out_ch, in_ch) layout
    w_qkv = jax.random.normal(k_qkv, (3 * HIDDEN, DIM), jnp.float32) * 0.1
    # to_out[0]: Conv2d(hidden, dim, 1) weight (out_ch, in_ch) + bias (out_ch, 1)
    w_out = jax.random.normal(k_wout, (DIM, HIDDEN), jnp.float32) * 0.1
    b_out = jax.random.normal(k_bout, (DIM, 1), jnp.float32) * 0.1
    # GroupNorm(1, dim) affine params, per-channel
    gamma = 1.0 + 0.1 * jax.random.normal(k_g, (DIM, 1), jnp.float32)
    beta = 0.1 * jax.random.normal(k_b, (DIM, 1), jnp.float32)

    out = linear_attention(x, w_qkv, w_out, b_out, gamma, beta)
    out = jax.block_until_ready(out)

    ref = linear_attention_ref(x, w_qkv, w_out, b_out, gamma, beta)
    assert out.shape == (B, DIM, H, W)
    # Tolerance covers bf16 matmul operands, bf16 exps (v6e/v7x), approx reciprocal,
    # and the bf16 output store (all accumulation is f32).
    assert jnp.allclose(out.astype(jnp.float32), ref, rtol=3e-2, atol=3e-2), \
        "mismatch vs reference"

    print("KERNEL_OK")
</pallas_src>

<mosaic_0001>
module attributes {stable_mosaic.version = 11 : i64} {
  func.func @linear_attention_kernel(%arg0: i32, %arg1: memref<1x4x256xbf16, #tpu.memory_space<vmem>>, %arg2: memref<384x4xbf16, #tpu.memory_space<vmem>>, %arg3: memref<4x128xbf16, #tpu.memory_space<vmem>>, %arg4: memref<4x1xf32, #tpu.memory_space<vmem>>, %arg5: memref<4x1xf32, #tpu.memory_space<vmem>>, %arg6: memref<4x1xf32, #tpu.memory_space<vmem>>, %arg7: memref<128x128xbf16, #tpu.memory_space<vmem>>, %arg8: memref<1x4x256xbf16, #tpu.memory_space<vmem>>) attributes {dimension_semantics = [#tpu.dimension_semantics<parallel>], iteration_bounds = array<i64: 2>, scalar_prefetch = 0 : i64, scratch_operands = 0 : i64, tpu.core_type = #tpu.core_type<tc>, window_params = [{transform_indices = @transform_0, window_bounds = array<i64: 1, 4, 256>}, {pipeline_mode = #tpu.pipeline_mode<synchronous>, transform_indices = @transform_1, window_bounds = array<i64: 384, 4>}, {pipeline_mode = #tpu.pipeline_mode<synchronous>, transform_indices = @transform_2, window_bounds = array<i64: 4, 128>}, {pipeline_mode = #tpu.pipeline_mode<synchronous>, transform_indices = @transform_3, window_bounds = array<i64: 4, 1>}, {pipeline_mode = #tpu.pipeline_mode<synchronous>, transform_indices = @transform_4, window_bounds = array<i64: 4, 1>}, {pipeline_mode = #tpu.pipeline_mode<synchronous>, transform_indices = @transform_5, window_bounds = array<i64: 4, 1>}, {pipeline_mode = #tpu.pipeline_mode<synchronous>, transform_indices = @transform_6, window_bounds = array<i64: 128, 128>}, {transform_indices = @transform_7, window_bounds = array<i64: 1, 4, 256>}]} {
    %c0 = arith.constant 0 : index
    %c0_0 = arith.constant 0 : index
    %0 = vector.load %arg2[%c0, %c0_0] : memref<384x4xbf16, #tpu.memory_space<vmem>>, vector<384x4xbf16>
    %c0_1 = arith.constant 0 : index
    %c0_2 = arith.constant 0 : index
    %1 = vector.load %arg3[%c0_1, %c0_2] : memref<4x128xbf16, #tpu.memory_space<vmem>>, vector<4x128xbf16>
    %c0_3 = arith.constant 0 : index
    %c0_4 = arith.constant 0 : index
    %2 = vector.load %arg7[%c0_3, %c0_4] : memref<128x128xbf16, #tpu.memory_space<vmem>>, vector<128x128xbf16>
    %c0_5 = arith.constant 0 : index
    %c0_6 = arith.constant 0 : index
    %3 = vector.load %arg4[%c0_5, %c0_6] : memref<4x1xf32, #tpu.memory_space<vmem>>, vector<4x1xf32>
    %c0_7 = arith.constant 0 : index
    %c0_8 = arith.constant 0 : index
    %4 = vector.load %arg5[%c0_7, %c0_8] : memref<4x1xf32, #tpu.memory_space<vmem>>, vector<4x1xf32>
    %c0_9 = arith.constant 0 : index
    %c0_10 = arith.constant 0 : index
    %5 = vector.load %arg6[%c0_9, %c0_10] : memref<4x1xf32, #tpu.memory_space<vmem>>, vector<4x1xf32>
    %c0_11 = arith.constant 0 : index
    %c0_12 = arith.constant 0 : index
    %c0_13 = arith.constant 0 : index
    %6 = vector.load %arg1[%c0_11, %c0_12, %c0_13] : memref<1x4x256xbf16, #tpu.memory_space<vmem>>, vector<1x4x256xbf16>
    %7 = vector.shape_cast %6 : vector<1x4x256xbf16> to vector<4x256xbf16>
    %8 = vector.extract_strided_slice %0 {offsets = [0, 0], sizes = [128, 4], strides = [1, 1]} : vector<384x4xbf16> to vector<128x4xbf16>
    %cst = arith.constant dense<0.000000e+00> : vector<128x256xf32>
    %9 = tpu.matmul %8, %7, %cst {dimension_numbers = #tpu.dot_dimension_numbers<[1], [0], [0], [1], [0, 0, 1, 1], [], []>} : vector<128x4xbf16>, vector<4x256xbf16>, vector<128x256xf32> -> vector<128x256xf32>
    %10 = vector.extract_strided_slice %0 {offsets = [128, 0], sizes = [128, 4], strides = [1, 1]} : vector<384x4xbf16> to vector<128x4xbf16>
    %cst_14 = arith.constant dense<0.000000e+00> : vector<128x256xf32>
    %11 = tpu.matmul %10, %7, %cst_14 {dimension_numbers = #tpu.dot_dimension_numbers<[1], [0], [0], [1], [0, 0, 1, 1], [], []>} : vector<128x4xbf16>, vector<4x256xbf16>, vector<128x256xf32> -> vector<128x256xf32>
    %12 = vector.extract_strided_slice %0 {offsets = [256, 0], sizes = [128, 4], strides = [1, 1]} : vector<384x4xbf16> to vector<128x4xbf16>
    %cst_15 = arith.constant dense<0.000000e+00> : vector<128x256xf32>
    %13 = tpu.matmul %12, %7, %cst_15 {dimension_numbers = #tpu.dot_dimension_numbers<[1], [0], [0], [1], [0, 0, 1, 1], [], []>} : vector<128x4xbf16>, vector<4x256xbf16>, vector<128x256xf32> -> vector<128x256xf32>
    %14 = arith.truncf %13 : vector<128x256xf32> to vector<128x256xbf16>
    %15 = vector.shape_cast %9 : vector<128x256xf32> to vector<4x32x256xf32>
    %cst_16 = arith.constant dense<0xFF800000> : vector<4x256xf32>
    %16 = vector.multi_reduction <maximumf>, %15, %cst_16 [1] : vector<4x32x256xf32> to vector<4x256xf32>
    %17 = vector.shape_cast %16 : vector<4x256xf32> to vector<4x1x256xf32>
    %18 = vector.broadcast %17 : vector<4x1x256xf32> to vector<4x32x256xf32>
    %19 = arith.subf %15, %18 : vector<4x32x256xf32>
    %20 = arith.truncf %19 : vector<4x32x256xf32> to vector<4x32x256xbf16>
    %21 = math.exp %20 : vector<4x32x256xbf16>
    %22 = arith.extf %21 : vector<4x32x256xbf16> to vector<4x32x256xf32>
    %cst_17 = arith.constant dense<0.000000e+00> : vector<4x256xf32>
    %23 = vector.multi_reduction <add>, %22, %cst_17 [1] : vector<4x32x256xf32> to vector<4x256xf32>
    %24 = vector.shape_cast %23 : vector<4x256xf32> to vector<4x1x256xf32>
    %25 = tpu.reciprocal %24 {approx = true} : vector<4x1x256xf32> -> vector<4x1x256xf32>
    %cst_18 = arith.constant 0.176776692 : f32
    %26 = vector.broadcast %cst_18 : f32 to vector<4x1x256xf32>
    %27 = arith.mulf %25, %26 : vector<4x1x256xf32>
    %28 = arith.truncf %27 : vector<4x1x256xf32> to vector<4x1x256xbf16>
    %29 = vector.broadcast %28 : vector<4x1x256xbf16> to vector<4x32x256xbf16>
    %30 = arith.mulf %21, %29 : vector<4x32x256xbf16>
    %31 = vector.shape_cast %30 : vector<4x32x256xbf16> to vector<128x256xbf16>
    %cst_19 = arith.constant dense<0xFF800000> : vector<128xf32>
    %32 = vector.multi_reduction <maximumf>, %11, %cst_19 [1] : vector<128x256xf32> to vector<128xf32>
    %33 = vector.shape_cast %32 : vector<128xf32> to vector<128x1xf32>
    %34 = vector.broadcast %33 : vector<128x1xf32> to vector<128x256xf32>
    %35 = arith.subf %11, %34 : vector<128x256xf32>
    %36 = arith.truncf %35 : vector<128x256xf32> to vector<128x256xbf16>
    %37 = math.exp %36 : vector<128x256xbf16>
    %38 = arith.extf %37 : vector<128x256xbf16> to vector<128x256xf32>
    %cst_20 = arith.constant dense<0.000000e+00> : vector<128xf32>
    %39 = vector.multi_reduction <add>, %38, %cst_20 [1] : vector<128x256xf32> to vector<128xf32>
    %40 = vector.shape_cast %39 : vector<128xf32> to vector<128x1xf32>
    %41 = tpu.reciprocal %40 {approx = true} : vector<128x1xf32> -> vector<128x1xf32>
    %42 = arith.truncf %41 : vector<128x1xf32> to vector<128x1xbf16>
    %43 = vector.broadcast %42 : vector<128x1xbf16> to vector<128x256xbf16>
    %44 = arith.mulf %37, %43 : vector<128x256xbf16>
    %cst_21 = arith.constant dense<0.000000e+00> : vector<128x128xf32>
    %45 = tpu.matmul %44, %14, %cst_21 {dimension_numbers = #tpu.dot_dimension_numbers<[1], [1], [0], [0], [0, 0, 1, 0], [], []>} : vector<128x256xbf16>, vector<128x256xbf16>, vector<128x128xf32> -> vector<128x128xf32>
    %46 = arith.truncf %45 : vector<128x128xf32> to vector<128x128xbf16>
    %47 = arith.mulf %46, %2 : vector<128x128xbf16>
    %cst_22 = arith.constant dense<0.000000e+00> : vector<4x128xf32>
    %48 = tpu.matmul %1, %47, %cst_22 {dimension_numbers = #tpu.dot_dimension_numbers<[1], [1], [0], [0], [0, 0, 1, 0], [], []>} : vector<4x128xbf16>, vector<128x128xbf16>, vector<4x128xf32> -> vector<4x128xf32>
    %49 = arith.truncf %48 : vector<4x128xf32> to vector<4x128xbf16>
    %cst_23 = arith.constant dense<0.000000e+00> : vector<4x256xf32>
    %50 = tpu.matmul %49, %31, %cst_23 {dimension_numbers = #tpu.dot_dimension_numbers<[1], [0], [0], [1], [0, 0, 1, 1], [], []>} : vector<4x128xbf16>, vector<128x256xbf16>, vector<4x256xf32> -> vector<4x256xf32>
    %51 = vector.broadcast %3 : vector<4x1xf32> to vector<4x256xf32>
    %52 = arith.addf %50, %51 : vector<4x256xf32>
    %53 = vector.shape_cast %52 : vector<4x256xf32> to vector<1x4x256xf32>
    %cst_24 = arith.constant dense<0.000000e+00> : vector<1xf32>
    %54 = vector.multi_reduction <add>, %53, %cst_24 [1, 2] : vector<1x4x256xf32> to vector<1xf32>
    %55 = vector.shape_cast %54 : vector<1xf32> to vector<1x1x1xf32>
    %56 = vector.extract %55[0, 0, 0] : f32 from vector<1x1x1xf32>
    %cst_25 = arith.constant 1.024000e+03 : f32
    %57 = arith.divf %56, %cst_25 : f32
    %58 = vector.broadcast %57 : f32 to vector<4x256xf32>
    %59 = arith.subf %52, %58 : vector<4x256xf32>
    %60 = arith.mulf %59, %59 : vector<4x256xf32>
    %61 = vector.shape_cast %60 : vector<4x256xf32> to vector<1x4x256xf32>
    %cst_26 = arith.constant dense<0.000000e+00> : vector<1xf32>
    %62 = vector.multi_reduction <add>, %61, %cst_26 [1, 2] : vector<1x4x256xf32> to vector<1xf32>
    %63 = vector.shape_cast %62 : vector<1xf32> to vector<1x1x1xf32>
    %64 = vector.extract %63[0, 0, 0] : f32 from vector<1x1x1xf32>
    %cst_27 = arith.constant 1.024000e+03 : f32
    %65 = arith.divf %64, %cst_27 : f32
    %cst_28 = arith.constant 9.99999974E-6 : f32
    %66 = arith.addf %65, %cst_28 : f32
    %67 = math.rsqrt %66 : f32
    %68 = vector.broadcast %67 : f32 to vector<4x256xf32>
    %69 = arith.mulf %59, %68 : vector<4x256xf32>
    %70 = vector.broadcast %4 : vector<4x1xf32> to vector<4x256xf32>
    %71 = arith.mulf %69, %70 : vector<4x256xf32>
    %72 = vector.broadcast %5 : vector<4x1xf32> to vector<4x256xf32>
    %73 = arith.addf %71, %72 : vector<4x256xf32>
    %74 = arith.truncf %73 : vector<4x256xf32> to vector<4x256xbf16>
    %c0_29 = arith.constant 0 : index
    %c0_30 = arith.constant 0 : index
    %c0_31 = arith.constant 0 : index
    %75 = vector.load %arg8[%c0_29, %c0_30, %c0_31] : memref<1x4x256xbf16, #tpu.memory_space<vmem>>, vector<1x4x256xbf16>
    %76 = vector.shape_cast %75 : vector<1x4x256xbf16> to vector<4x256xbf16>
    %77 = vector.shape_cast %74 : vector<4x256xbf16> to vector<1x4x256xbf16>
    tpu.vector_store %arg8[%c0_29, %c0_30, %c0_31], %77 {strides = array<i32>} : memref<1x4x256xbf16, #tpu.memory_space<vmem>>, vector<1x4x256xbf16>,
    return
  }
  func.func @transform_0(%arg0: i32) -> (i32, i32, i32) {
    %c0_i32 = arith.constant 0 : i32
    %c0_i32_0 = arith.constant 0 : i32
    %c0_i32_1 = arith.constant 0 : i32
    return %arg0, %c0_i32, %c0_i32_0 : i32, i32, i32
  }
  func.func @transform_1(%arg0: i32) -> (i32, i32) {
    %c0_i32 = arith.constant 0 : i32
    %c0_i32_0 = arith.constant 0 : i32
    %c0_i32_1 = arith.constant 0 : i32
    return %c0_i32, %c0_i32_0 : i32, i32
  }
  func.func @transform_2(%arg0: i32) -> (i32, i32) {
    %c0_i32 = arith.constant 0 : i32
    %c0_i32_0 = arith.constant 0 : i32
    %c0_i32_1 = arith.constant 0 : i32
    return %c0_i32, %c0_i32_0 : i32, i32
  }
  func.func @transform_3(%arg0: i32) -> (i32, i32) {
    %c0_i32 = arith.constant 0 : i32
    %c0_i32_0 = arith.constant 0 : i32
    %c0_i32_1 = arith.constant 0 : i32
    return %c0_i32, %c0_i32_0 : i32, i32
  }
  func.func @transform_4(%arg0: i32) -> (i32, i32) {
    %c0_i32 = arith.constant 0 : i32
    %c0_i32_0 = arith.constant 0 : i32
    %c0_i32_1 = arith.constant 0 : i32
    return %c0_i32, %c0_i32_0 : i32, i32
  }
  func.func @transform_5(%arg0: i32) -> (i32, i32) {
    %c0_i32 = arith.constant 0 : i32
    %c0_i32_0 = arith.constant 0 : i32
    %c0_i32_1 = arith.constant 0 : i32
    return %c0_i32, %c0_i32_0 : i32, i32
  }
  func.func @transform_6(%arg0: i32) -> (i32, i32) {
    %c0_i32 = arith.constant 0 : i32
    %c0_i32_0 = arith.constant 0 : i32
    %c0_i32_1 = arith.constant 0 : i32
    return %c0_i32, %c0_i32_0 : i32, i32
  }
  func.func @transform_7(%arg0: i32) -> (i32, i32, i32) {
    %c0_i32 = arith.constant 0 : i32
    %c0_i32_0 = arith.constant 0 : i32
    %c0_i32_1 = arith.constant 0 : i32
    return %arg0, %c0_i32, %c0_i32_0 : i32, i32, i32
  }
}

</mosaic_0001>

<bundles_post_ra>
// kernel: tpu_custom_call.1
= control target key start
LH: loop header
LB: loop body
LE: loop exit
PB: predicated region body
PF: predicated region fallthrough
CT: control target
= control target key end

     0   :  { %12 = vsyncpa [#allocation3], 0  ;;  %s3045_s0 = inlined_call_operand.vmem [shape: bf16[2,4,256], index: 0, kind: input, shape index: {}]   ;;  %s3046_s1 = inlined_call_operand.vmem [shape: bf16[384,4], index: 1, kind: input, shape index: {}]   ;;  %s3047_s2 = inlined_call_operand.vmem [shape: bf16[4,128], index: 2, kind: input, shape index: {}]   ;;  %s3048_s3 = inlined_call_operand.vmem [shape: f32[4,1], index: 3, kind: input, shape index: {}]   ;;  %s3049_s4 = inlined_call_operand.vmem [shape: f32[4,1], index: 4, kind: input, shape index: {}]   ;;  %s3050_s5 = inlined_call_operand.vmem [shape: f32[4,1], index: 5, kind: input, shape index: {}]   ;;  %s3051_s6 = inlined_call_operand.vmem [shape: bf16[128,128], index: 6, kind: input, shape index: {}]   ;;  %s3052_s7 = inlined_call_operand.hbm [shape: bf16[2,4,256], index: 7, kind: output, shape index: {}]  }
   0x1   :  { %14 = vsyncpa [#allocation3 + $0x1], 0  ;;  %s2289_s24 = smov 0   ;;  %s2291_s25 = smov 0  }
   0x2   :  { %s2293_s26 = smov 0   ;;  %s2295_s27 = smov 0  }
   0x3 LB: > { %s2310_s28 = sadd.s32 4294967295, %s2243_s27   ;;  %s1880_s29 = sadd.s32 4294967294, %s2243_s27   ;;  %s2243_s27 = sphi %s2295_s27, %s3110_s27   ;;  %s2239_s26 = sphi %s2293_s26, %s3109_s26   ;;  %s2235_s25 = sphi %s2291_s25, %s3108_s25   ;;  %s2231_s24 = sphi %s2289_s24, %s3107_s24  }
   0x4   : > { %s2314_s30 = sadd.s32 1, %s2243_s27   ;;  %s179_s8 = sadd.s32 1, %s2239_s26 }
   0x5   : > { %s176_s9 = ssub.s32 %s2243_s27, %s2314_s30  ;;  %p189_p0 = scmp.ne.s32.totalorder %s2239_s26, %s2235_s25 }
   0x6   : > { %p177_p1 = scmp.eq.s32.totalorder %s176_s9, 0  ;;  %p190_p2 = scmp.eq.s32.totalorder %s2310_s28, 1 }
   0x7   : > { %p195_p3 = scmp.ne.s32.totalorder %s2235_s25, %s2231_s24  ;;  %p196_p4 = scmp.eq.s32.totalorder %s1880_s29, 1 }
   0x8   : > { %s2325_s10 = scalar_select %p177_p1, %s2239_s26, %s179_s8  }
   0x9   : > { %p2327_p5 = por %p190_p2, %p189_p0  ;;  %p2331_p6 = por %p196_p4, %p195_p3 }
   0xa   : > { %p1883_p7 = scmp.ge.s32.totalorder %s2243_s27, 1  ;;  %p240_p8 = scmp.lt.s32.totalorder %s2243_s27, 3 }
   0xc   : > { %p241_p9 = pnand %p1883_p7, %p240_p8 }
   0xe   : > { %244 = sbr.rel (%p241_p9) target bundleno = 1797 (0x705), region = 48 }
  0x15   : > { %p272_p10 = scmp.lt.s32.totalorder %s2310_s28, 1  ;;  %v3053_v0 = vmov 0   ;;  %vm421_vm0 = vcmask 1041408   ;;  %v2035_v4 = vld [vmem:[%s3046_s1 + $0x40] sm:$0xff]   ;;  %vm396_vm1 = vcmask 31744   ;;  %v2036_v6 = vld [vmem:[%s3046_s1 + $0x48] sm:$0xff]  }
  0x16   : > { %637 = vmatprep.mubr.bf16.mxu1 %v3053_v0  ;;  %460 = vmatprep.mubr.bf16.mxu0 %v3053_v0  ;;  %v2043_v5 = vld [vmem:[%s3046_s1] sm:$0xff]   ;;  %v2044_v7 = vld [vmem:[%s3046_s1 + $0x8] sm:$0xff]   ;;  %v2037_v8 = vld [vmem:[%s3046_s1 + $0x50] sm:$0xff]   ;;  %vm2247_vm2 = vmmov 0   ;;  %vm1735_vm3 = vcmask 1043456   ;;  %s269_s8 = sand.u32 1, %s2235_s25  }
  0x17   : > { %s273_s13 = scalar_select %p272_p10, %s2310_s28, 1  ;;  %2033 = vset.pattern.permute.xlu0 %v3053_v0  ;;  %2034 = vset.pattern.permute.xlu1 %v3053_v0  ;;  %v2045_v9 = vld [vmem:[%s3046_s1 + $0x10] sm:$0xff]   ;;  %v2038_v10 = vld [vmem:[%s3046_s1 + $0x58] sm:$0xff]   ;;  %v2039_v12 = vld [vmem:[%s3046_s1 + $0x60] sm:$0xff]  }
  0x18   : > { %v2046_v11 = vld [vmem:[%s3046_s1 + $0x18] sm:$0xff]   ;;  %v2047_v13 = vld [vmem:[%s3046_s1 + $0x20] sm:$0xff]   ;;  %v2040_v14 = vld [vmem:[%s3046_s1 + $0x68] sm:$0xff]   ;;  %s1884_s9 = sshll.u32 %s269_s8, 2  ;;  %s1807_s20 = scalar_lea.sflag [#allocation3], %s269_s8 }
  0x19   : > { %s1954_s14 = sshll.u32 %s273_s13, 2  ;;  %v2048_v15 = vld [vmem:[%s3046_s1 + $0x28] sm:$0xff]   ;;  %v2041_v16 = vld [vmem:[%s3046_s1 + $0x70] sm:$0xff]   ;;  %v2042_v18 = vld [vmem:[%s3046_s1 + $0x78] sm:$0xff]   ;;  %s271_s15 = scalar_lea.vmem [#allocation2], %s1884_s9 }
  0x1a   : > { %s276_s17 = scalar_lea.vmem %s3045_s0, %s1954_s14  ;;  %v2049_v17 = vld [vmem:[%s3046_s1 + $0x30] sm:$0xff]   ;;  %v2050_v19 = vld [vmem:[%s3046_s1 + $0x38] sm:$0xff]   ;;  %v2051_v20 = vld [vmem:[%s3046_s1 + $0x80] sm:$0xff]   ;;  %s1955_s14 = sshll.u32 %s2310_s28, 6 }
  0x1b   : > { %v1895_v1 = vld.sshfl [vmem:[%s276_s17] sm:$0x33 pattern:$0x76325410]  ;;  %v2052_v21 = vld [vmem:[%s3046_s1 + $0x88] sm:$0xff]   ;;  %v2053_v22 = vld [vmem:[%s3046_s1 + $0x90] sm:$0xff]   ;;  %s3003_s19 = scalar_lea.hbm %s3052_s7, %s1955_s14 }
  0x1c   : > { %v395_v2 = vcombine.high %v1895_v1, %v1895_v1  ;;  %v423_v3 = vsel %vm421_vm0, %v1895_v1, 0  ;;  %v2054_v23 = vld [vmem:[%s3046_s1 + $0x98] sm:$0xff]   ;;  %v2055_v24 = vld [vmem:[%s3046_s1 + $0xa0] sm:$0xff]   ;;  %v2056_v25 = vld [vmem:[%s3046_s1 + $0xa8] sm:$0xff]   ;;  %s2248_s28 = smov [#allocation2]  }
  0x1d   : > { %v2057_v26 = vld [vmem:[%s3046_s1 + $0xb0] sm:$0xff]   ;;  %v2058_v27 = vld [vmem:[%s3046_s1 + $0xb8] sm:$0xff]  }
  0x1e   : > { %1913 = vmatprep.subr.msk.bf16.mxu1 %vm421_vm0, %v395_v2  ;;  %1896 = vmatprep.subr.msk.bf16.mxu0 %vm421_vm0, %v395_v2 }
  0x1f   : > { %606 = vmatpush1.bf16.msra.mxu1 %v423_v3  ;;  %429 = vmatpush1.bf16.msra.mxu0 %v423_v3 }
  0x20   : > { %1930 = vmatprep.subr.msk.bf16.mxu0 %vm421_vm0, %v395_v2 }
  0x22   : > { %1914 = vmatmul.mubr.msk.bf16.vlgmr.msra.gmra.mrb[0].mxu1 %vm396_vm1, %v2035_v4  ;;  %1897 = vmatmul.mubr.msk.bf16.vlgmr.msra.gmra.mrb[0].mxu0 %vm396_vm1, %v2043_v5 }
  0x23   : > { %647 = vmatprep.mubr.bf16.mxu1 %v3053_v0  ;;  %470 = vmatprep.mubr.bf16.mxu0 %v3053_v0 }
  0x24   : > { %783 = vmatpush1.bf16.msra.mxu0 %v423_v3 }
  0x2a   : > { %1915 = vmatmul.mubr.msk.bf16.gmra.mrb[4].mxu1 %vm396_vm1, %v2036_v6  ;;  %1898 = vmatmul.mubr.msk.bf16.gmra.mrb[4].mxu0 %vm396_vm1, %v2044_v7 }
  0x2b   : > { %657 = vmatprep.mubr.bf16.mxu1 %v3053_v0  ;;  %480 = vmatprep.mubr.bf16.mxu0 %v3053_v0 }
  0x32   : > { %1916 = vmatmul.mubr.msk.bf16.gmra.mrb[8].mxu1 %vm396_vm1, %v2037_v8  ;;  %1899 = vmatmul.mubr.msk.bf16.gmra.mrb[8].mxu0 %vm396_vm1, %v2045_v9 }
  0x33   : > { %667 = vmatprep.mubr.bf16.mxu1 %v3053_v0  ;;  %490 = vmatprep.mubr.bf16.mxu0 %v3053_v0 }
  0x3a   : > { %1917 = vmatmul.mubr.msk.bf16.gmra.mrb[12].mxu1 %vm396_vm1, %v2038_v10  ;;  %1900 = vmatmul.mubr.msk.bf16.gmra.mrb[12].mxu0 %vm396_vm1, %v2046_v11 }
  0x3b   : > { %677 = vmatprep.mubr.bf16.mxu1 %v3053_v0  ;;  %500 = vmatprep.mubr.bf16.mxu0 %v3053_v0 }
  0x42   : > { %1918 = vmatmul.mubr.msk.bf16.gmra.mrb[16].mxu1 %vm396_vm1, %v2039_v12  ;;  %1901 = vmatmul.mubr.msk.bf16.gmra.mrb[16].mxu0 %vm396_vm1, %v2047_v13 }
  0x43   : > { %687 = vmatprep.mubr.bf16.mxu1 %v3053_v0  ;;  %510 = vmatprep.mubr.bf16.mxu0 %v3053_v0 }
  0x4a   : > { %1919 = vmatmul.mubr.msk.bf16.gmra.mrb[20].mxu1 %vm396_vm1, %v2040_v14  ;;  %1902 = vmatmul.mubr.msk.bf16.gmra.mrb[20].mxu0 %vm396_vm1, %v2048_v15 }
  0x4b   : > { %697 = vmatprep.mubr.bf16.mxu1 %v3053_v0  ;;  %520 = vmatprep.mubr.bf16.mxu0 %v3053_v0 }
  0x52   : > { %1920 = vmatmul.mubr.msk.bf16.gmra.mrb[24].mxu1 %vm396_vm1, %v2041_v16  ;;  %1903 = vmatmul.mubr.msk.bf16.gmra.mrb[24].mxu0 %vm396_vm1, %v2049_v17 }
  0x53   : > { %707 = vmatprep.mubr.bf16.mxu1 %v3053_v0  ;;  %530 = vmatprep.mubr.bf16.mxu0 %v3053_v0 }
  0x5a   : > { %1921 = vmatmul.mubr.msk.bf16.gmra.mrb[28].mxu1 %vm396_vm1, %v2042_v18  ;;  %1904 = vmatmul.mubr.msk.bf16.gmra.mrb[28].mxu0 %vm396_vm1, %v2050_v19 }
  0x5b   : > { %814 = vmatprep.mubr.bf16.mxu0 %v3053_v0 }
  0x62   : > { %1931 = vmatmul.mubr.msk.bf16.vlgmr.msra.gmra.mrb[32].mxu0 %vm396_vm1, %v2051_v20 }
  0x63   : > { %824 = vmatprep.mubr.bf16.mxu0 %v3053_v0 }
  0x6a   : > { %1932 = vmatmul.mubr.msk.bf16.gmra.mrb[36].mxu0 %vm396_vm1, %v2052_v21 }
  0x6b   : > { %834 = vmatprep.mubr.bf16.mxu0 %v3053_v0 }
  0x72   : > { %1933 = vmatmul.mubr.msk.bf16.gmra.mrb[40].mxu0 %vm396_vm1, %v2053_v22 }
  0x73   : > { %844 = vmatprep.mubr.bf16.mxu0 %v3053_v0 }
  0x7a   : > { %1934 = vmatmul.mubr.msk.bf16.gmra.mrb[44].mxu0 %vm396_vm1, %v2054_v23 }
  0x7b   : > { %854 = vmatprep.mubr.bf16.mxu0 %v3053_v0 }
  0x82   : > { %1935 = vmatmul.mubr.msk.bf16.gmra.mrb[48].mxu0 %vm396_vm1, %v2055_v24 }
  0x83   : > { %864 = vmatprep.mubr.bf16.mxu0 %v3053_v0 }
  0x8a   : > { %1936 = vmatmul.mubr.msk.bf16.gmra.mrb[52].mxu0 %vm396_vm1, %v2056_v25 }
  0x8b   : > { %874 = vmatprep.mubr.bf16.mxu0 %v3053_v0 }
  0x92   : > { %1937 = vmatmul.mubr.msk.bf16.gmra.mrb[56].mxu0 %vm396_vm1, %v2057_v26 }
  0x93   : > { %884 = vmatprep.mubr.bf16.mxu0 %v3053_v0 }
  0x9a   : > { %1938 = vmatmul.mubr.msk.bf16.gmra.mrb[60].mxu0 %vm396_vm1, %v2058_v27 }
  0xf5   : > { %v2464_v28 = vpop.f32.mrb[0].mxu1  ;;  %v2466_v29 = vpop.f32.mrb[0].mxu0 }
  0xf6   : > { %v2468_v30 = vpop.f32.mrb[1].mxu1  ;;  %v2470_v31 = vpop.f32.mrb[1].mxu0 }
  0xf7   : > { %v2472_v32 = vpop.f32.mrb[2].mxu1  ;;  %v1223_v33 = vmax.f32 %v2464_v28, %v2468_v30  ;;  %v2476_v34 = vpop.f32.mrb[2].mxu0 }
  0xf8   : > { %v2478_v35 = vpop.f32.mrb[3].mxu1  ;;  %v911_v36 = vmax.f32 %v2466_v29, %v2476_v34  ;;  %v2482_v37 = vpop.f32.mrb[3].mxu0 }
  0xf9   : > { %1224 = vmax.xlane.f32.xlu0 %v1223_v33  ;;  %v1226_v38 = vmax.f32 %v2472_v32, %v2478_v35  ;;  %v920_v39 = vmax.f32 %v2470_v31, %v2482_v37 }
  0xfd   : > { %1227 = vmax.xlane.f32.xlu0 %v1226_v38  ;;  %v2488_v40 = vpop.f32.mrb[4].mxu1  ;;  %v472_v41 = vpop.f32.mrb[4].mxu0 }
  0xfe   : > { %v2490_v42 = vpop.f32.mrb[5].mxu1  ;;  %v912_v43 = vmax.f32 %v911_v36, %v472_v41  ;;  %v2492_v44 = vpop.f32.mrb[5].mxu0 }
  0xff   : > { %v2494_v45 = vpop.f32.mrb[6].mxu1  ;;  %v1229_v46 = vmax.f32 %v2488_v40, %v2490_v42  ;;  %v921_v47 = vmax.f32 %v920_v39, %v2492_v44  ;;  %v476_v48 = vpop.f32.mrb[6].mxu0 }
 0x100   : > { %v2499_v49 = vpop.f32.mrb[7].mxu1  ;;  %v913_v50 = vmax.f32 %v912_v43, %v476_v48  ;;  %v478_v51 = vpop.f32.mrb[7].mxu0 }
 0x101   : > { %1230 = vmax.xlane.f32.xlu1 %v1229_v46  ;;  %v1232_v52 = vmax.f32 %v2494_v45, %v2499_v49  ;;  %v922_v53 = vmax.f32 %v921_v47, %v478_v51 }
 0x102   : > { %v914_v54 = vrot.slane %v913_v50, 4 }
 0x103   : > { %v923_v55 = vrot.slane %v922_v53, 4 }
 0x104   : > { %v915_v56 = vmax.f32 %v913_v50, %v914_v54 }
 0x105   : > { %1233 = vmax.xlane.f32.xlu1 %v1232_v52  ;;  %v2503_v57 = vpop.f32.mrb[8].mxu1  ;;  %v924_v58 = vmax.f32 %v922_v53, %v923_v55  ;;  %v2505_v59 = vpop.f32.mrb[8].mxu0 }
 0x106   : > { %v2507_v60 = vpop.f32.mrb[9].mxu1  ;;  %v916_v61 = vrot.slane %v915_v56, 2  ;;  %v2509_v62 = vpop.f32.mrb[9].mxu0 }
 0x107   : > { %v2511_v63 = vpop.f32.mrb[10].mxu1  ;;  %v1235_v1 = vmax.f32 %v2503_v57, %v2507_v60  ;;  %v925_v2 = vrot.slane %v924_v58, 2  ;;  %v2515_v3 = vpop.f32.mrb[10].mxu0 }
 0x108   : > { %v2517_v4 = vpop.f32.mrb[11].mxu1  ;;  %v917_v5 = vmax.f32 %v915_v56, %v916_v61  ;;  %v929_v6 = vmax.f32 %v2505_v59, %v2515_v3  ;;  %v2521_v7 = vpop.f32.mrb[11].mxu0 }
 0x109   : > { %1236 = vmax.xlane.f32.xlu0 %v1235_v1  ;;  %v1238_v8 = vmax.f32 %v2511_v63, %v2517_v4  ;;  %v926_v9 = vmax.f32 %v924_v58, %v925_v2  ;;  %v938_v10 = vmax.f32 %v2509_v62, %v2521_v7 }
 0x10a   : > { %v918_v11 = vrot.slane %v917_v5, 1 }
 0x10b   : > { %1239 = vmax.xlane.f32.xlu1 %v1238_v8  ;;  %v927_v12 = vrot.slane %v926_v9, 1 }
 0x10c   : > { %v919_v13 = vmax.f32 %v917_v5, %v918_v11 }
 0x10d   : > { %v2527_v14 = vpop.f32.mrb[12].mxu1  ;;  %v928_v15 = vmax.f32 %v926_v9, %v927_v12  ;;  %v2529_v16 = vpop.f32.mrb[12].mxu0 }
 0x10e   : > { %v2531_v17 = vpop.f32.mrb[13].mxu1  ;;  %v983_v18 = vsub.f32 %v2466_v29, %v919_v13  ;;  %v985_v19 = vsub.f32 %v2476_v34, %v919_v13  ;;  %v987_v20 = vsub.f32 %v472_v41, %v919_v13  ;;  %v989_v21 = vsub.f32 %v476_v48, %v919_v13  ;;  %v2535_v22 = vpop.f32.mrb[13].mxu0 }
 0x10f   : > { %v2537_v23 = vpop.f32.mrb[14].mxu1  ;;  %v1241_v24 = vmax.f32 %v2527_v14, %v2531_v17  ;;  %v984_v25 = vsub.f32 %v2470_v31, %v928_v15  ;;  %v986_v26 = vsub.f32 %v2482_v37, %v928_v15  ;;  %v988_v27 = vsub.f32 %v2492_v44, %v928_v15  ;;  %v2544_v33 = vpop.f32.mrb[14].mxu0 }
 0x110   : > { %v2546_v29 = vpop.f32.mrb[15].mxu1  ;;  %v1015_v34 = vpack.c.bf16 %v985_v19, %v983_v18  ;;  %v1017_v36 = vpack.c.bf16 %v989_v21, %v987_v20  ;;  %v990_v38 = vsub.f32 %v478_v51, %v928_v15  ;;  %v930_v39 = vmax.f32 %v929_v6, %v2529_v16  ;;  %v2549_v41 = vpop.f32.mrb[15].mxu0 }
 0x111   : > { %1242 = vmax.xlane.f32.xlu0 %v1241_v24  ;;  %v1244_v43 = vmax.f32 %v2537_v23, %v2546_v29  ;;  %v1016_v31 = vpack.c.bf16 %v986_v26, %v984_v25  ;;  %v939_v37 = vmax.f32 %v938_v10, %v2535_v22 }
 0x112   : > { %v1018_v46 = vpack.c.bf16 %v990_v38, %v988_v27  ;;  %v931_v44 = vmax.f32 %v930_v39, %v2544_v33  ;;  %v1032_v11 = vmul.bf16 1069105081, %v1015_v34  ;;  %v1038_v19 = vmul.bf16 1069105081, %v1017_v36 }
 0x113   : > { %1245 = vmax.xlane.f32.xlu1 %v1244_v43  ;;  %v940_v47 = vmax.f32 %v939_v37, %v2549_v41  ;;  %v1035_v5 = vmul.bf16 1069105081, %v1016_v31 }
 0x114   : > { %v932_v48 = vrot.slane %v931_v44, 4  ;;  %v1041_v15 = vmul.bf16 1069105081, %v1018_v46 }
 0x115   : > { %v2556_v50 = vpop.f32.mrb[16].mxu1  ;;  %v941_v51 = vrot.slane %v940_v47, 4  ;;  %v2558_v52 = vpop.f32.mrb[16].mxu0  ;;  %2067 = vpow.bf16 %v1035_v5 }
 0x116   : > { %v2560_v53 = vpop.f32.mrb[17].mxu1  ;;  %v933_v54 = vmax.f32 %v931_v44, %v932_v48  ;;  %v2562_v55 = vpop.f32.mrb[17].mxu0  ;;  %2069 = vpow.bf16 %v1032_v11 }
 0x117   : > { %v2564_v56 = vpop.f32.mrb[18].mxu1  ;;  %v1247_v58 = vmax.f32 %v2556_v50, %v2560_v53  ;;  %v942_v61 = vmax.f32 %v940_v47, %v941_v51  ;;  %v2568_v1 = vpop.f32.mrb[18].mxu0  ;;  %2071 = vpow.bf16 %v1041_v15 }
 0x118   : > { %v2570_v2 = vpop.f32.mrb[19].mxu1  ;;  %v934_v6 = vrot.slane %v933_v54, 2  ;;  %v947_v8 = vmax.f32 %v2558_v52, %v2568_v1  ;;  %v2574_v9 = vpop.f32.mrb[19].mxu0  ;;  %2073 = vpow.bf16 %v1038_v19 }
 0x119   : > { %1248 = vmax.xlane.f32.xlu0 %v1247_v58  ;;  %v1250_v10 = vmax.f32 %v2564_v56, %v2570_v2  ;;  %v943_v12 = vrot.slane %v942_v61, 2  ;;  %v956_v13 = vmax.f32 %v2562_v55, %v2574_v9 }
 0x11a   : > { %v935_v18 = vmax.f32 %v933_v54, %v934_v6 }
 0x11b   : > { %1251 = vmax.xlane.f32.xlu1 %v1250_v10  ;;  %v944_v20 = vmax.f32 %v942_v61, %v943_v12 }
 0x11c   : > { %v936_v21 = vrot.slane %v935_v18, 1 }
 0x11d   : > { %v2580_v24 = vpop.f32.mrb[20].mxu1  ;;  %v945_v25 = vrot.slane %v944_v20, 1  ;;  %v2582_v26 = vpop.f32.mrb[20].mxu0 }
 0x11e   : > { %3070 = vst [vmem:[#allocation5_spill] sm:$0xff] %v2580_v24  ;;  %v2584_v27 = vpop.f32.mrb[21].mxu1  ;;  %v937_v34 = vmax.f32 %v935_v18, %v936_v21  ;;  %v948_v38 = vmax.f32 %v947_v8, %v2582_v26  ;;  %v2587_v39 = vpop.f32.mrb[21].mxu0 }
 0x11f   : > { %3071 = vst [vmem:[#allocation6_spill] sm:$0xff] %v2584_v27  ;;  %v2589_v43 = vpop.f32.mrb[22].mxu1  ;;  %v1253_v36 = vmax.f32 %v2580_v24, %v2584_v27  ;;  %v946_v31 = vmax.f32 %v944_v20, %v945_v25  ;;  %v957_v37 = vmax.f32 %v956_v13, %v2587_v39  ;;  %v2594_v46 = vpop.f32.mrb[22].mxu0 }
 0x120   : > { %3072 = vst [vmem:[#allocation7_spill] sm:$0xff] %v2589_v43  ;;  %v2596_v44 = vpop.f32.mrb[23].mxu1  ;;  %v991_v47 = vsub.f32 %v2505_v59, %v937_v34  ;;  %v993_v48 = vsub.f32 %v2515_v3, %v937_v34  ;;  %v995_v51 = vsub.f32 %v2529_v16, %v937_v34  ;;  %v997_v54 = vsub.f32 %v2544_v33, %v937_v34  ;;  %v2602_v58 = vpop.f32.mrb[23].mxu0 }
 0x121   : > { %3073 = vst [vmem:[#allocation8_spill] sm:$0xff] %v2596_v44  ;;  %1254 = vmax.xlane.f32.xlu0 %v1253_v36  ;;  %v1256_v61 = vmax.f32 %v2589_v43, %v2596_v44  ;;  %v992_v5 = vsub.f32 %v2509_v62, %v946_v31  ;;  %v994_v6 = vsub.f32 %v2521_v7, %v946_v31 }
 0x122   : > { %v996_v8 = vsub.f32 %v2535_v22, %v946_v31  ;;  %v1019_v10 = vpack.c.bf16 %v993_v48, %v991_v47  ;;  %v1021_v59 = vpack.c.bf16 %v997_v54, %v995_v51  ;;  %v998_v3 = vsub.f32 %v2549_v41, %v946_v31  ;;  %v2620_v41 = vpop.eup %2067 }
 0x123   : > { %v949_v16 = vmax.f32 %v948_v38, %v2594_v46  ;;  %1257 = vmax.xlane.f32.xlu1 %v1256_v61  ;;  %v1020_v33 = vpack.c.bf16 %v994_v6, %v992_v5  ;;  %v958_v11 = vmax.f32 %v957_v37, %v2602_v58  ;;  %v2628_v31 = vpop.eup %2069 }
 0x124   : > { %v1022_v12 = vpack.c.bf16 %v998_v3, %v996_v8  ;;  %v1044_v22 = vmul.bf16 1069105081, %v1019_v10  ;;  %v1050_v34 = vmul.bf16 1069105081, %v1021_v59  ;;  %v2636_v61 = vpop.eup %2071 }
 0x125   : > { %v950_v13 = vrot.slane %v949_v16, 4  ;;  %v2612_v15 = vpop.f32.mrb[24].mxu1  ;;  %v959_v18 = vrot.slane %v958_v11, 4  ;;  %v2614_v62 = vpop.f32.mrb[24].mxu0  ;;  %v1047_v47 = vmul.bf16 1069105081, %v1020_v33  ;;  %v1082_v33 = vunpack.c.h.bf16 %v2620_v41 }
 0x126   : > { %3074 = vst [vmem:[#allocation9_spill] sm:$0xff] %v2612_v15  ;;  %v2616_v7 = vpop.f32.mrb[25].mxu1  ;;  %v2618_v20 = vpop.f32.mrb[25].mxu0  ;;  %3078 = vst [vmem:[#allocation13_spill] sm:$0xff] %v2636_v61  ;;  %v1053_v6 = vmul.bf16 1069105081, %v1022_v12  ;;  %2075 = vpow.bf16 %v1044_v22 }
 0x127   : > { %3075 = vst [vmem:[#allocation10_spill] sm:$0xff] %v2616_v7  ;;  %v951_v19 = vmax.f32 %v949_v16, %v950_v13  ;;  %v2622_v21 = vpop.f32.mrb[26].mxu1  ;;  %v1259_v25 = vmax.f32 %v2612_v15, %v2616_v7  ;;  %v960_v38 = vmax.f32 %v958_v11, %v959_v18  ;;  %v2626_v36 = vpop.f32.mrb[26].mxu0  ;;  %v1080_v16 = vunpack.c.l.bf16 %v2620_v41 }
 0x128   : > { %3076 = vst [vmem:[#allocation11_spill] sm:$0xff] %v2622_v21  ;;  %v2630_v37 = vpop.f32.mrb[27].mxu1  ;;  %v965_v51 = vmax.f32 %v2614_v62, %v2626_v36  ;;  %v2634_v54 = vpop.f32.mrb[27].mxu0  ;;  %2077 = vpow.bf16 %v1050_v34  ;;  %v1079_v13 = vunpack.c.l.bf16 %v2628_v31  ;;  %v1081_v18 = vunpack.c.h.bf16 %v2628_v31 }
 0x129   : > { %3077 = vst [vmem:[#allocation12_spill] sm:$0xff] %v2630_v37  ;;  %v952_v48 = vrot.slane %v951_v19, 2  ;;  %1260 = vmax.xlane.f32.xlu0 %v1259_v25  ;;  %v1262_v5 = vmax.f32 %v2622_v21, %v2630_v37  ;;  %v961_v8 = vrot.slane %v960_v38, 2  ;;  %v974_v10 = vmax.f32 %v2618_v20, %v2634_v54  ;;  %v2642_v59 = vpop.eup %2073 }
 0x12a   : > { %3079 = vst [vmem:[#allocation14_spill] sm:$0xff] %v2642_v59  ;;  %2079 = vpow.bf16 %v1047_v47  ;;  %v1084_v25 = vunpack.c.l.bf16 %v2636_v61  ;;  %v1120_v0 = vadd.f32 %v1082_v33, %v1080_v16  ;;  %v1086_v47 = vunpack.c.h.bf16 %v2636_v61 }
 0x12b   : > { %v953_v3 = vmax.f32 %v951_v19, %v952_v48  ;;  %1263 = vmax.xlane.f32.xlu1 %v1262_v5  ;;  %v962_v11 = vmax.f32 %v960_v38, %v961_v8  ;;  %2081 = vpow.bf16 %v1053_v6  ;;  %v1083_v48 = vunpack.c.l.bf16 %v2642_v59 }
 0x12c   : > { %v1111_v5 = vadd.f32 %v1081_v18, %v1079_v13  ;;  %v1121_v7 = vadd.f32 %v1120_v0, %v1084_v25  ;;  %v1085_v13 = vunpack.c.h.bf16 %v2642_v59 }
 0x12d   : > { %v954_v12 = vrot.slane %v953_v3, 1  ;;  %v2649_v37 = vpop.f32.mrb[28].mxu1  ;;  %v963_v22 = vrot.slane %v962_v11, 1  ;;  %v2651_v19 = vpop.f32.mrb[28].mxu0 }
 0x12e   : > { %3080 = vst [vmem:[#allocation15_spill] sm:$0xff] %v2649_v37  ;;  %v2654_v34 = vpop.f32.mrb[29].mxu1  ;;  %v966_v8 = vmax.f32 %v965_v51, %v2651_v19  ;;  %v2657_v21 = vpop.f32.mrb[29].mxu0  ;;  %v1112_v43 = vadd.f32 %v1111_v5, %v1083_v48 }
 0x12f   : > { %3081 = vst [vmem:[#allocation16_spill] sm:$0xff] %v2654_v34  ;;  %v955_v38 = vmax.f32 %v953_v3, %v954_v12  ;;  %v2660_v16 = vpop.f32.mrb[30].mxu1  ;;  %v1265_v6 = vmax.f32 %v2649_v37, %v2654_v34  ;;  %v964_v33 = vmax.f32 %v962_v11, %v963_v22  ;;  %v975_v15 = vmax.f32 %v974_v10, %v2657_v21  ;;  %v2665_v44 = vpop.f32.mrb[30].mxu0 }
 0x130   : > { %3082 = vst [vmem:[#allocation17_spill] sm:$0xff] %v2660_v16  ;;  %v2668_v3 = vpop.f32.mrb[31].mxu1  ;;  %v2674_v25 = vpop.f32.mrb[31].mxu0 }
 0x131   : > { %3083 = vst [vmem:[#allocation18_spill] sm:$0xff] %v2668_v3  ;;  %v999_v51 = vsub.f32 %v2558_v52, %v955_v38  ;;  %v1001_v18 = vsub.f32 %v2568_v1, %v955_v38  ;;  %v1003_v0 = vsub.f32 %v2582_v26, %v955_v38  ;;  %v1005_v12 = vsub.f32 %v2594_v46, %v955_v38 }
 0x132   : > { %1266 = vmax.xlane.f32.xlu0 %v1265_v6  ;;  %v1268_v10 = vmax.f32 %v2660_v16, %v2668_v3  ;;  %v1000_v11 = vsub.f32 %v2562_v55, %v964_v33  ;;  %v1002_v22 = vsub.f32 %v2574_v9, %v964_v33  ;;  %v1004_v34 = vsub.f32 %v2587_v39, %v964_v33  ;;  %v2684_v55 = vpop.eup %2075 }
 0x133   : > { %v1023_v37 = vpack.c.bf16 %v1001_v18, %v999_v51  ;;  %v1025_v52 = vpack.c.bf16 %v1005_v12, %v1003_v0  ;;  %v1006_v1 = vsub.f32 %v2602_v58, %v964_v33  ;;  %v967_v26 = vmax.f32 %v966_v8, %v2665_v44  ;;  %v2686_v0 = vpop.eup %2077 }
 0x134   : > { %1269 = vmax.xlane.f32.xlu1 %v1268_v10  ;;  %v1024_v46 = vpack.c.bf16 %v1002_v22, %v1000_v11  ;;  %v976_v38 = vmax.f32 %v975_v15, %v2674_v25  ;;  %v1122_v6 = vadd.f32 %v1121_v7, %v1086_v47  ;;  %v1113_v18 = vadd.f32 %v1112_v43, %v1085_v13 }
 0x135   : > { %v1056_v27 = vmul.bf16 1069105081, %v1023_v37  ;;  %v1026_v3 = vpack.c.bf16 %v1006_v1, %v1004_v34  ;;  %v968_v16 = vrot.slane %v967_v26, 4  ;;  %v1062_v9 = vmul.bf16 1069105081, %v1025_v52  ;;  %v816_v39 = vpop.f32.mrb[32].mxu0  ;;  %v2688_v12 = vpop.eup %2079 }
 0x136   : > { %v977_v24 = vrot.slane %v976_v38, 4  ;;  %v1123_v51 = vrot.slane %v1122_v6, 4  ;;  %v1059_v58 = vmul.bf16 1069105081, %v1024_v46  ;;  %v818_v33 = vpop.f32.mrb[33].mxu0  ;;  %v1114_v5 = vrot.slane %v1113_v18, 4  ;;  %v2690_v34 = vpop.eup %2081 }
 0x137   : > { %v969_v8 = vmax.f32 %v967_v26, %v968_v16  ;;  %v1065_v15 = vmul.bf16 1069105081, %v1026_v3  ;;  %v820_v48 = vpop.f32.mrb[34].mxu0  ;;  %2083 = vpow.bf16 %v1056_v27  ;;  %v1088_v46 = vunpack.c.l.bf16 %v2688_v12 }
 0x138   : > { %v978_v7 = vmax.f32 %v976_v38, %v977_v24  ;;  %v1124_v37 = vadd.f32 %v1123_v51, %v1122_v6  ;;  %v895_v10 = vpack.c.bf16 %v820_v48, %v816_v39  ;;  %v822_v11 = vpop.f32.mrb[35].mxu0  ;;  %2085 = vpow.bf16 %v1062_v9 }
 0x139   : > { %v970_v47 = vrot.slane %v969_v8, 2  ;;  %v896_v13 = vpack.c.bf16 %v822_v11, %v818_v33  ;;  %2087 = vpow.bf16 %v1059_v58  ;;  %v1115_v52 = vadd.f32 %v1114_v5, %v1113_v18 }
 0x13a   : > { %v979_v43 = vrot.slane %v978_v7, 2  ;;  %v1125_v22 = vrot.slane %v1124_v37, 2  ;;  %2089 = vpow.bf16 %v1065_v15  ;;  %v1090_v27 = vunpack.c.h.bf16 %v2688_v12 }
 0x13b   : > { %v971_v16 = vmax.f32 %v969_v8, %v970_v47  ;;  %1487 = vmatprep.subr.bf16.mxu1 %v896_v13  ;;  %v1116_v26 = vrot.slane %v1115_v52, 2  ;;  %v1087_v39 = vunpack.c.l.bf16 %v2684_v55  ;;  %v1089_v51 = vunpack.c.h.bf16 %v2684_v55 }
 0x13c   : > { %v980_v1 = vmax.f32 %v978_v7, %v979_v43  ;;  %v1126_v24 = vadd.f32 %v1125_v22, %v1124_v37  ;;  %1488 = vmatpush1.bf16.xpose.msra.mxu1 %v895_v10  ;;  %v1092_v33 = vunpack.c.l.bf16 %v2690_v34  ;;  %v1138_v15 = vadd.f32 %v1090_v27, %v1088_v46 }
 0x13d   : > { %v972_v3 = vrot.slane %v971_v16, 1  ;;  %v826_v6 = vpop.f32.mrb[36].mxu0  ;;  %v1117_v8 = vadd.f32 %v1116_v26, %v1115_v52  ;;  %v1091_v5 = vunpack.c.l.bf16 %v2686_v0  ;;  %v1129_v47 = vadd.f32 %v1089_v51, %v1087_v39 }
 0x13e   : > { %v981_v38 = vrot.slane %v980_v1, 1  ;;  %v1127_v9 = vrot.slane %v1126_v24, 1  ;;  %v828_v18 = vpop.f32.mrb[37].mxu0 }
 0x13f   : > { %v973_v58 = vmax.f32 %v971_v16, %v972_v3  ;;  %v830_v48 = vpop.f32.mrb[38].mxu0 }
 0x140   : > { %v982_v7 = vmax.f32 %v980_v1, %v981_v38  ;;  %v1128_v37 = vadd.f32 %v1127_v9, %v1126_v24  ;;  %v832_v22 = vpop.f32.mrb[39].mxu0  ;;  %v897_v46 = vpack.c.bf16 %v830_v48, %v826_v6  ;;  %v1093_v6 = vunpack.c.h.bf16 %v2686_v0 }
 0x141   : > { %v1007_v10 = vsub.f32 %v2614_v62, %v973_v58  ;;  %v1009_v11 = vsub.f32 %v2626_v36, %v973_v58  ;;  %v1011_v43 = vsub.f32 %v2651_v19, %v973_v58  ;;  %v1013_v13 = vsub.f32 %v2665_v44, %v973_v58 }
 0x142   : > { %v1008_v16 = vsub.f32 %v2618_v20, %v982_v7  ;;  %v1010_v52 = vsub.f32 %v2634_v54, %v982_v7  ;;  %v1012_v1 = vsub.f32 %v2657_v21, %v982_v7  ;;  %v1014_v24 = vsub.f32 %v2674_v25, %v982_v7  ;;  %v2706_v62 = vpop.eup %2083 }
 0x143   : > { %v1027_v3 = vpack.c.bf16 %v1009_v11, %v1007_v10  ;;  %v1029_v26 = vpack.c.bf16 %v1013_v13, %v1011_v43  ;;  %v898_v27 = vpack.c.bf16 %v832_v22, %v828_v18  ;;  %2091 = vrcp.f32 %v1128_v37  ;;  %v2708_v44 = vpop.eup %2085 }
 0x144   : > { %v1028_v36 = vpack.c.bf16 %v1010_v52, %v1008_v16  ;;  %v1030_v38 = vpack.c.bf16 %v1014_v24, %v1012_v1  ;;  %v1118_v19 = vrot.slane %v1117_v8, 1  ;;  %v1094_v20 = vunpack.c.h.bf16 %v2690_v34  ;;  %v2711_v9 = vpop.eup %2087 }
 0x145   : > { %1489 = vmatprep.subr.bf16.mxu1 %v898_v27  ;;  %v1139_v54 = vadd.f32 %v1138_v15, %v1092_v33  ;;  %v1068_v21 = vmul.bf16 1069105081, %v1027_v3  ;;  %v836_v25 = vpop.f32.mrb[40].mxu0  ;;  %v2714_v39 = vpop.eup %2089  ;;  %v1130_v7 = vadd.f32 %v1129_v47, %v1091_v5  ;;  %v1074_v48 = vmul.bf16 1069105081, %v1029_v26 }
 0x146   : > { %1490 = vmatpush1.bf16.xpose.msra.mxu1 %v897_v46  ;;  %v838_v51 = vpop.f32.mrb[41].mxu0  ;;  %v1119_v58 = vadd.f32 %v1118_v19, %v1117_v8  ;;  %v1071_v33 = vmul.bf16 1069105081, %v1028_v36  ;;  %v1077_v52 = vmul.bf16 1069105081, %v1030_v38  ;;  %v1096_v8 = vunpack.c.l.bf16 %v2711_v9 }
 0x147   : > { %v1140_v18 = vadd.f32 %v1139_v54, %v1094_v20  ;;  %v840_v37 = vpop.f32.mrb[42].mxu0  ;;  %v1131_v13 = vadd.f32 %v1130_v7, %v1093_v6  ;;  %2093 = vpow.bf16 %v1068_v21  ;;  %v1098_v5 = vunpack.c.h.bf16 %v2711_v9 }
 0x148   : > { %v899_v10 = vpack.c.bf16 %v840_v37, %v836_v25  ;;  %v842_v11 = vpop.f32.mrb[43].mxu0  ;;  %2095 = vrcp.f32 %v1119_v58  ;;  %v1095_v26 = vunpack.c.l.bf16 %v2706_v62  ;;  %v1097_v46 = vunpack.c.h.bf16 %v2706_v62 }
 0x149   : > { %v1141_v43 = vrot.slane %v1140_v18, 4  ;;  %v900_v15 = vpack.c.bf16 %v842_v11, %v838_v51  ;;  %v1132_v16 = vrot.slane %v1131_v13, 4  ;;  %2097 = vpow.bf16 %v1074_v48 }
 0x14a   : > { %2099 = vpow.bf16 %v1071_v33  ;;  %v1100_v38 = vunpack.c.l.bf16 %v2714_v39  ;;  %v1156_v21 = vadd.f32 %v1098_v5, %v1096_v8  ;;  %v1099_v25 = vunpack.c.l.bf16 %v2708_v44 }
 0x14b   : > { %v1142_v22 = vadd.f32 %v1141_v43, %v1140_v18  ;;  %1491 = vmatprep.subr.bf16.mxu1 %v900_v15  ;;  %v1133_v24 = vadd.f32 %v1132_v16, %v1131_v13  ;;  %2101 = vpow.bf16 %v1077_v52  ;;  %v1147_v6 = vadd.f32 %v1097_v46, %v1095_v26 }
 0x14c   : > { %v1157_v11 = vadd.f32 %v1156_v21, %v1100_v38  ;;  %v1101_v43 = vunpack.c.h.bf16 %v2708_v44 }
 0x14d   : > { %v1143_v1 = vrot.slane %v1142_v22, 2  ;;  %v2092_v47 = vpop.eup %2091  ;;  %v846_v3 = vpop.f32.mrb[44].mxu0  ;;  %v1134_v20 = vrot.slane %v1133_v24, 2 }
 0x14e   : > { %1492 = vmatpush1.bf16.xpose.msra.mxu1 %v899_v10  ;;  %v848_v27 = vpop.f32.mrb[45].mxu0  ;;  %v1192_v36 = vmul.f32 0.17677669, %v2092_v47  ;;  %v1102_v10 = vunpack.c.h.bf16 %v2714_v39 }
 0x14f   : > { %v1144_v19 = vadd.f32 %v1143_v1, %v1142_v22  ;;  %v850_v54 = vpop.f32.mrb[46].mxu0  ;;  %v1135_v48 = vadd.f32 %v1134_v20, %v1133_v24  ;;  %v1148_v22 = vadd.f32 %v1147_v6, %v1099_v25 }
 0x150   : > { %v901_v51 = vpack.c.bf16 %v850_v54, %v846_v3  ;;  %v852_v58 = vpop.f32.mrb[47].mxu0  ;;  %v2722_v18 = vpack.c.bf16 %v1192_v36, %v1192_v36  ;;  %v1158_v16 = vadd.f32 %v1157_v11, %v1102_v10 }
 0x151   : > { %v1145_v7 = vrot.slane %v1144_v19, 1  ;;  %v902_v37 = vpack.c.bf16 %v852_v58, %v848_v27  ;;  %v1136_v15 = vrot.slane %v1135_v48, 1  ;;  %v1149_v24 = vadd.f32 %v1148_v22, %v1101_v43 }
 0x152   : > { %v2728_v52 = vpop.eup %2093  ;;  %v1159_v3 = vrot.slane %v1158_v16, 4 }
 0x153   : > { %v1146_v33 = vadd.f32 %v1145_v7, %v1144_v19  ;;  %1493 = vmatprep.subr.bf16.mxu1 %v902_v37  ;;  %v2096_v1 = vpop.eup %2095  ;;  %v1137_v8 = vadd.f32 %v1136_v15, %v1135_v48  ;;  %v1150_v27 = vrot.slane %v1149_v24, 4  ;;  %v1103_v22 = vunpack.c.l.bf16 %v2728_v52 }
 0x154   : > { %v1191_v47 = vmul.f32 0.17677669, %v2096_v1  ;;  %v2730_v26 = vpop.eup %2097  ;;  %v1160_v38 = vadd.f32 %v1159_v3, %v1158_v16 }
 0x155   : > { %2103 = vrcp.f32 %v1146_v33  ;;  %v856_v5 = vpop.f32.mrb[48].mxu0  ;;  %v2736_v54 = vpop.eup %2099  ;;  %v1151_v6 = vadd.f32 %v1150_v27, %v1149_v24  ;;  %v1107_v27 = vunpack.c.l.bf16 %v2730_v26 }
 0x156   : > { %1494 = vmatpush1.bf16.xpose.msra.mxu1 %v901_v51  ;;  %v858_v46 = vpop.f32.mrb[49].mxu0  ;;  %2105 = vrcp.f32 %v1137_v8  ;;  %v2732_v19 = vpack.c.bf16 %v1191_v47, %v1191_v47  ;;  %v1161_v48 = vrot.slane %v1160_v38, 2  ;;  %v2742_v37 = vpop.eup %2101  ;;  %v1104_v33 = vunpack.c.l.bf16 %v2736_v54 }
 0x157   : > { %v860_v36 = vpop.f32.mrb[50].mxu0  ;;  %v1152_v10 = vrot.slane %v1151_v6, 2  ;;  %v1106_v15 = vunpack.c.h.bf16 %v2736_v54  ;;  %v1105_v8 = vunpack.c.h.bf16 %v2728_v52  ;;  %v1108_v3 = vunpack.c.l.bf16 %v2742_v37 }
 0x158   : > { %v903_v21 = vpack.c.bf16 %v860_v36, %v856_v5  ;;  %v862_v25 = vpop.f32.mrb[51].mxu0  ;;  %v1162_v11 = vadd.f32 %v1161_v48, %v1160_v38  ;;  %v1110_v7 = vunpack.c.h.bf16 %v2742_v37 }
 0x159   : > { %v904_v51 = vpack.c.bf16 %v862_v25, %v858_v46  ;;  %v1153_v43 = vadd.f32 %v1152_v10, %v1151_v6  ;;  %v1174_v46 = vadd.f32 %v1106_v15, %v1104_v33  ;;  %v1165_v6 = vadd.f32 %v1105_v8, %v1103_v22 }
 0x15a   : > { %v1163_v1 = vrot.slane %v1162_v11, 1  ;;  %v1109_v15 = vunpack.c.h.bf16 %v2730_v26 }
 0x15b   : > { %1495 = vmatprep.subr.bf16.mxu1 %v904_v51  ;;  %v1154_v47 = vrot.slane %v1153_v43, 1  ;;  %v1175_v20 = vadd.f32 %v1174_v46, %v1108_v3  ;;  %v1166_v61 = vadd.f32 %v1165_v6, %v1107_v27 }
 0x15c   : > { %v1164_v25 = vadd.f32 %v1163_v1, %v1162_v11 }
 0x15d   : > { %v866_v16 = vpop.f32.mrb[52].mxu0  ;;  %v1176_v33 = vadd.f32 %v1175_v20, %v1110_v7 }
 0x15e   : > { %1496 = vmatpush1.bf16.xpose.msra.mxu1 %v903_v21  ;;  %v868_v5 = vpop.f32.mrb[53].mxu0  ;;  %v1155_v21 = vadd.f32 %v1154_v47, %v1153_v43  ;;  %2107 = vrcp.f32 %v1164_v25 }
 0x15f   : > { %v2104_v24 = vpop.eup %2103  ;;  %v870_v36 = vpop.f32.mrb[54].mxu0  ;;  %v1177_v43 = vrot.slane %v1176_v33, 4 }
 0x160   : > { %v1194_v38 = vmul.f32 0.17677669, %v2104_v24  ;;  %v2106_v51 = vpop.eup %2105  ;;  %v905_v48 = vpack.c.bf16 %v870_v36, %v866_v16  ;;  %v872_v10 = vpop.f32.mrb[55].mxu0  ;;  %2109 = vrcp.f32 %v1155_v21  ;;  %v1167_v16 = vadd.f32 %v1166_v61, %v1109_v15 }
 0x161   : > { %v906_v58 = vpack.c.bf16 %v872_v10, %v868_v5  ;;  %v1193_v59 = vmul.f32 0.17677669, %v2106_v51  ;;  %v1178_v5 = vadd.f32 %v1177_v43, %v1176_v33 }
 0x162   : > { %v2751_v13 = vpack.c.bf16 %v1194_v38, %v1194_v38  ;;  %v1168_v47 = vrot.slane %v1167_v16, 4 }
 0x163   : > { %1497 = vmatprep.subr.bf16.mxu1 %v906_v58  ;;  %v2756_v22 = vpack.c.bf16 %v1193_v59, %v1193_v59  ;;  %v1179_v46 = vrot.slane %v1178_v5, 2 }
 0x164   : > { %v1212_v11 = vmul.bf16 %v2688_v12, %v2751_v13  ;;  %v1169_v27 = vadd.f32 %v1168_v47, %v1167_v16 }
 0x165   : > { %v876_v1 = vpop.f32.mrb[56].mxu0  ;;  %v1211_v8 = vmul.bf16 %v2684_v55, %v2756_v22  ;;  %v1180_v36 = vadd.f32 %v1179_v46, %v1178_v5  ;;  %v3084_v46 = vmul.bf16 %v2620_v41, %v2722_v18  ;;  %v3103_v12 = vmul.bf16 %v2686_v0, %v2756_v22 }
 0x166   : > { %1498 = vmatpush1.bf16.xpose.msra.mxu1 %v905_v48  ;;  %v878_v24 = vpop.f32.mrb[57].mxu0  ;;  %v1170_v38 = vrot.slane %v1169_v27, 2 }
 0x167   : > { %v880_v20 = vpop.f32.mrb[58].mxu0  ;;  %v1181_v48 = vrot.slane %v1180_v36, 1 }
 0x168   : > { %v907_v3 = vpack.c.bf16 %v880_v20, %v876_v1  ;;  %v882_v59 = vpop.f32.mrb[59].mxu0  ;;  %v2108_v25 = vpop.eup %2107  ;;  %v1171_v10 = vadd.f32 %v1170_v38, %v1169_v27 }
 0x169   : > { %v908_v61 = vpack.c.bf16 %v882_v59, %v878_v24  ;;  %v1196_v51 = vmul.f32 0.17677669, %v2108_v25  ;;  %v1182_v58 = vadd.f32 %v1181_v48, %v1180_v36 }
 0x16a   : > { %v2110_v6 = vpop.eup %2109  ;;  %v1172_v1 = vrot.slane %v1171_v10, 1 }
 0x16b   : > { %1499 = vmatprep.subr.bf16.mxu1 %v908_v61  ;;  %v1195_v33 = vmul.f32 0.17677669, %v2110_v6  ;;  %v2764_v43 = vpack.c.bf16 %v1196_v51, %v1196_v51  ;;  %2111 = vrcp.f32 %v1182_v58 }
 0x16c   : > { %v1173_v47 = vadd.f32 %v1172_v1, %v1171_v10 }
 0x16d   : > { %v886_v21 = vpop.f32.mrb[60].mxu0  ;;  %v2766_v7 = vpack.c.bf16 %v1195_v33, %v1195_v33  ;;  %v1216_v5 = vmul.bf16 %v2711_v9, %v2764_v43  ;;  %v1218_v27 = vmul.bf16 %v2714_v39, %v2764_v43 }
 0x16e   : > { %1500 = vmatpush1.bf16.xpose.msra.mxu1 %v907_v3  ;;  %v888_v15 = vpop.f32.mrb[61].mxu0  ;;  %2113 = vrcp.f32 %v1173_v47 }
 0x16f   : > { %v890_v20 = vpop.f32.mrb[62].mxu0  ;;  %v1215_v3 = vmul.bf16 %v2706_v62, %v2766_v7  ;;  %v1217_v61 = vmul.bf16 %v2708_v44, %v2766_v7 }
 0x170   : > { %v909_v16 = vpack.c.bf16 %v890_v20, %v886_v21  ;;  %v892_v24 = vpop.f32.mrb[63].mxu0 }
 0x171   : > { %v910_v59 = vpack.c.bf16 %v892_v24, %v888_v15 }
 0x173   : > { %1501 = vmatprep.subr.bf16.mxu1 %v910_v59 }
 0x175   : > { %v2112_v36 = vpop.eup %2111 }
 0x176   : > { %1502 = vmatpush1.bf16.xpose.msra.mxu1 %v909_v16  ;;  %v1198_v58 = vmul.f32 0.17677669, %v2112_v36 }
 0x177   : > { %1694 = vmatprep.subr.bf16.mxu1 %v3084_v46 }
 0x178   : > { %v2114_v38 = vpop.eup %2113  ;;  %v2779_v25 = vpack.c.bf16 %v1198_v58, %v1198_v58 }
 0x179   : > { %v1197_v6 = vmul.f32 0.17677669, %v2114_v38 }
 0x17a   : > { %v1220_v51 = vmul.bf16 %v2736_v54, %v2779_v25  ;;  %v3104_v44 = vmul.bf16 %v2742_v37, %v2779_v25 }
 0x17b   : > { %v2783_v48 = vpack.c.bf16 %v1197_v6, %v1197_v6 }
 0x17d   : > { %v1219_v41 = vmul.bf16 %v2728_v52, %v2783_v48  ;;  %v3105_v54 = vmul.bf16 %v2730_v26, %v2783_v48 }
 0x186   : > { %v1225_v10 = vpop.xlane.xlu0 %1224 }
 0x187   : > { %v1271_v1 = vsub.f32 %v2464_v28, %v1225_v10  ;;  %v1272_v20 = vsub.f32 %v2468_v30, %v1225_v10 }
 0x18a   : > { %v1228_v15 = vpop.xlane.xlu0 %1227 }
 0x18b   : > { %v1273_v16 = vsub.f32 %v2472_v32, %v1228_v15  ;;  %v1274_v24 = vsub.f32 %v2478_v35, %v1228_v15 }
 0x18d   : > { %v1303_v47 = vpack.c.bf16 %v1273_v16, %v1271_v1  ;;  %v1304_v59 = vpack.c.bf16 %v1274_v24, %v1272_v20 }
 0x18e   : > { %v1231_v46 = vpop.xlane.xlu1 %1230 }
 0x18f   : > { %v1320_v36 = vmul.bf16 1069105081, %v1303_v47  ;;  %v1323_v58 = vmul.bf16 1069105081, %v1304_v59  ;;  %v1275_v6 = vsub.f32 %v2488_v40, %v1231_v46  ;;  %v1276_v33 = vsub.f32 %v2490_v42, %v1231_v46 }
 0x191   : > { %2115 = vpow.bf16 %v1320_v36 }
 0x192   : > { %2117 = vpow.bf16 %v1323_v58  ;;  %v1234_v38 = vpop.xlane.xlu1 %1233 }
 0x193   : > { %v1277_v28 = vsub.f32 %v2494_v45, %v1234_v38  ;;  %v1278_v30 = vsub.f32 %v2499_v49, %v1234_v38 }
 0x195   : > { %v1305_v10 = vpack.c.bf16 %v1277_v28, %v1275_v6  ;;  %v1306_v32 = vpack.c.bf16 %v1278_v30, %v1276_v33 }
 0x196   : > { %v1237_v21 = vpop.xlane.xlu0 %1236 }
 0x197   : > { %v1326_v35 = vmul.bf16 1069105081, %v1305_v10  ;;  %v1329_v15 = vmul.bf16 1069105081, %v1306_v32  ;;  %v1279_v1 = vsub.f32 %v2503_v57, %v1237_v21  ;;  %v1280_v16 = vsub.f32 %v2507_v60, %v1237_v21 }
 0x198   : > { %v1240_v20 = vpop.xlane.xlu1 %1239 }
 0x199   : > { %2119 = vpow.bf16 %v1326_v35  ;;  %v1281_v24 = vsub.f32 %v2511_v63, %v1240_v20  ;;  %v1282_v40 = vsub.f32 %v2517_v4, %v1240_v20 }
 0x19a   : > { %2121 = vpow.bf16 %v1329_v15 }
 0x19b   : > { %v1307_v42 = vpack.c.bf16 %v1281_v24, %v1279_v1  ;;  %v1308_v45 = vpack.c.bf16 %v1282_v40, %v1280_v16 }
 0x19c   : > { %v2803_v47 = vpop.eup %2115 }
 0x19d   : > { %v2805_v49 = vpop.eup %2117  ;;  %v1332_v33 = vmul.bf16 1069105081, %v1307_v42  ;;  %v1335_v59 = vmul.bf16 1069105081, %v1308_v45  ;;  %v1367_v46 = vunpack.c.l.bf16 %v2803_v47  ;;  %v1369_v57 = vunpack.c.h.bf16 %v2803_v47 }
 0x19e   : > { %v1243_v36 = vpop.xlane.xlu0 %1242  ;;  %v1368_v60 = vunpack.c.l.bf16 %v2805_v49  ;;  %v1370_v63 = vunpack.c.h.bf16 %v2805_v49 }
 0x19f   : > { %2123 = vpow.bf16 %v1332_v33  ;;  %v1283_v38 = vsub.f32 %v2527_v14, %v1243_v36  ;;  %v1284_v6 = vsub.f32 %v2531_v17, %v1243_v36 }
 0x1a0   : > { %2125 = vpow.bf16 %v1335_v59  ;;  %v1246_v4 = vpop.xlane.xlu1 %1245  ;;  %v1399_v21 = vadd.f32 %v1368_v60, %v1367_v46  ;;  %v1402_v58 = vadd.f32 %v1370_v63, %v1369_v57 }
 0x1a1   : > { %v1285_v28 = vsub.f32 %v2537_v23, %v1246_v4  ;;  %v1286_v30 = vsub.f32 %v2546_v29, %v1246_v4 }
 0x1a2   : > { %1400 = vadd.xlane.f32.xlu0 %v1399_v21  ;;  %1403 = vadd.xlane.f32.xlu1 %v1402_v58 }
 0x1a3   : > { %v1309_v10 = vpack.c.bf16 %v1285_v28, %v1283_v38  ;;  %v1310_v32 = vpack.c.bf16 %v1286_v30, %v1284_v6  ;;  %v3085_v30 = vld [vmem:[#allocation5_spill] sm:$0xff] }
 0x1a4   : > { %v2815_v35 = vpop.eup %2119 }
 0x1a5   : > { %v2817_v15 = vpop.eup %2121  ;;  %v1338_v1 = vmul.bf16 1069105081, %v1309_v10  ;;  %v1341_v20 = vmul.bf16 1069105081, %v1310_v32  ;;  %v1371_v16 = vunpack.c.l.bf16 %v2815_v35  ;;  %v1373_v14 = vunpack.c.h.bf16 %v2815_v35  ;;  %v3086_v32 = vld [vmem:[#allocation6_spill] sm:$0xff] }
 0x1a6   : > { %v1249_v24 = vpop.xlane.xlu0 %1248  ;;  %v1372_v17 = vunpack.c.l.bf16 %v2817_v15  ;;  %v1374_v23 = vunpack.c.h.bf16 %v2817_v15 }
 0x1a7   : > { %2127 = vpow.bf16 %v1338_v1  ;;  %v1287_v45 = vsub.f32 %v2556_v50, %v1249_v24  ;;  %v1288_v33 = vsub.f32 %v2560_v53, %v1249_v24 }
 0x1a8   : > { %2129 = vpow.bf16 %v1341_v20  ;;  %v1252_v29 = vpop.xlane.xlu1 %1251  ;;  %v1405_v40 = vadd.f32 %v1372_v17, %v1371_v16  ;;  %v1408_v42 = vadd.f32 %v1374_v23, %v1373_v14  ;;  %v3087_v20 = vld [vmem:[#allocation7_spill] sm:$0xff]  ;;  %v3088_v14 = vld [vmem:[#allocation8_spill] sm:$0xff] }
 0x1a9   : > { %v1289_v59 = vsub.f32 %v2564_v56, %v1252_v29  ;;  %v1290_v46 = vsub.f32 %v2570_v2, %v1252_v29 }
 0x1aa   : > { %v2827_v57 = vpop.eup %2123  ;;  %1406 = vadd.xlane.f32.xlu0 %v1405_v40  ;;  %1409 = vadd.xlane.f32.xlu1 %v1408_v42 }
 0x1ab   : > { %v2829_v36 = vpop.eup %2125  ;;  %v1311_v60 = vpack.c.bf16 %v1289_v59, %v1287_v45  ;;  %v1312_v63 = vpack.c.bf16 %v1290_v46, %v1288_v33  ;;  %v1375_v4 = vunpack.c.l.bf16 %v2827_v57  ;;  %v1377_v21 = vunpack.c.h.bf16 %v2827_v57 }
 0x1ac   : > { %v1376_v50 = vunpack.c.l.bf16 %v2829_v36  ;;  %v1378_v53 = vunpack.c.h.bf16 %v2829_v36 }
 0x1ad   : > { %v1344_v58 = vmul.bf16 1069105081, %v1311_v60  ;;  %v1347_v56 = vmul.bf16 1069105081, %v1312_v63 }
 0x1ae   : > { %v1255_v38 = vpop.xlane.xlu0 %1254  ;;  %v1411_v2 = vadd.f32 %v1376_v50, %v1375_v4  ;;  %v1414_v6 = vadd.f32 %v1378_v53, %v1377_v21  ;;  %v3089_v53 = vld [vmem:[#allocation9_spill] sm:$0xff] }
 0x1af   : > { %2131 = vpow.bf16 %v1344_v58  ;;  %v1291_v10 = vsub.f32 %v3085_v30, %v1255_v38  ;;  %v1292_v1 = vsub.f32 %v3086_v32, %v1255_v38 }
 0x1b0   : > { %2133 = vpow.bf16 %v1347_v56  ;;  %1412 = vadd.xlane.f32.xlu0 %v1411_v2  ;;  %1415 = vadd.xlane.f32.xlu1 %v1414_v6  ;;  %v1258_v28 = vpop.xlane.xlu1 %1257  ;;  %v3090_v56 = vld [vmem:[#allocation10_spill] sm:$0xff]  ;;  %v3091_v2 = vld [vmem:[#allocation11_spill] sm:$0xff] }
 0x1b1   : > { %v1293_v16 = vsub.f32 %v3087_v20, %v1258_v28  ;;  %v1294_v24 = vsub.f32 %v3088_v14, %v1258_v28  ;;  %v3092_v28 = vld [vmem:[#allocation12_spill] sm:$0xff] }
 0x1b2   : > { %v2839_v17 = vpop.eup %2127 }
 0x1b3   : > { %v2841_v23 = vpop.eup %2129  ;;  %v1313_v29 = vpack.c.bf16 %v1293_v16, %v1291_v10  ;;  %v1314_v40 = vpack.c.bf16 %v1294_v24, %v1292_v1  ;;  %v1379_v42 = vunpack.c.l.bf16 %v2839_v17  ;;  %v1381_v45 = vunpack.c.h.bf16 %v2839_v17 }
 0x1b4   : > { %v1380_v33 = vunpack.c.l.bf16 %v2841_v23  ;;  %v1382_v59 = vunpack.c.h.bf16 %v2841_v23 }
 0x1b5   : > { %v1350_v46 = vmul.bf16 1069105081, %v1313_v29  ;;  %v1353_v60 = vmul.bf16 1069105081, %v1314_v40 }
 0x1b6   : > { %v1261_v63 = vpop.xlane.xlu0 %1260  ;;  %v1417_v4 = vadd.f32 %v1380_v33, %v1379_v42  ;;  %v1420_v21 = vadd.f32 %v1382_v59, %v1381_v45 }
 0x1b7   : > { %2135 = vpow.bf16 %v1350_v46  ;;  %v1295_v58 = vsub.f32 %v3089_v53, %v1261_v63  ;;  %v1296_v38 = vsub.f32 %v3090_v56, %v1261_v63 }
 0x1b8   : > { %2137 = vpow.bf16 %v1353_v60  ;;  %1418 = vadd.xlane.f32.xlu0 %v1417_v4  ;;  %1421 = vadd.xlane.f32.xlu1 %v1420_v21  ;;  %v1264_v50 = vpop.xlane.xlu1 %1263  ;;  %v3093_v60 = vld [vmem:[#allocation15_spill] sm:$0xff]  ;;  %v3094_v4 = vld [vmem:[#allocation16_spill] sm:$0xff] }
 0x1b9   : > { %v1297_v6 = vsub.f32 %v3091_v2, %v1264_v50  ;;  %v1298_v30 = vsub.f32 %v3092_v28, %v1264_v50  ;;  %v3095_v50 = vld [vmem:[#allocation17_spill] sm:$0xff] }
 0x1ba   : > { %v2851_v10 = vpop.eup %2131 }
 0x1bb   : > { %v2853_v32 = vpop.eup %2133  ;;  %v1315_v1 = vpack.c.bf16 %v1297_v6, %v1295_v58  ;;  %v1316_v20 = vpack.c.bf16 %v1298_v30, %v1296_v38  ;;  %v1383_v16 = vunpack.c.l.bf16 %v2851_v10  ;;  %v1385_v14 = vunpack.c.h.bf16 %v2851_v10  ;;  %v3096_v58 = vld [vmem:[#allocation18_spill] sm:$0xff] }
 0x1bc   : > { %v1384_v24 = vunpack.c.l.bf16 %v2853_v32  ;;  %v1386_v29 = vunpack.c.h.bf16 %v2853_v32 }
 0x1bd   : > { %v1356_v40 = vmul.bf16 1069105081, %v1315_v1  ;;  %v1359_v42 = vmul.bf16 1069105081, %v1316_v20 }
 0x1be   : > { %v1423_v33 = vadd.f32 %v1384_v24, %v1383_v16  ;;  %v1426_v59 = vadd.f32 %v1386_v29, %v1385_v14 }
 0x1bf   : > { %v1267_v45 = vpop.xlane.xlu0 %1266  ;;  %2139 = vpow.bf16 %v1356_v40 }
 0x1c0   : > { %2141 = vpow.bf16 %v1359_v42  ;;  %1424 = vadd.xlane.f32.xlu0 %v1423_v33  ;;  %1427 = vadd.xlane.f32.xlu1 %v1426_v59  ;;  %v1299_v63 = vsub.f32 %v3093_v60, %v1267_v45  ;;  %v1300_v21 = vsub.f32 %v3094_v4, %v1267_v45 }
 0x1c1   : > { %v1270_v46 = vpop.xlane.xlu1 %1269 }
 0x1c2   : > { %v1301_v53 = vsub.f32 %v3095_v50, %v1270_v46  ;;  %v1302_v56 = vsub.f32 %v3096_v58, %v1270_v46  ;;  %v2863_v38 = vpop.eup %2135 }
 0x1c3   : > { %v2865_v2 = vpop.eup %2137  ;;  %v1387_v30 = vunpack.c.l.bf16 %v2863_v38  ;;  %v1389_v1 = vunpack.c.h.bf16 %v2863_v38 }
 0x1c4   : > { %v1317_v6 = vpack.c.bf16 %v1301_v53, %v1299_v63  ;;  %v1318_v28 = vpack.c.bf16 %v1302_v56, %v1300_v21  ;;  %v1388_v20 = vunpack.c.l.bf16 %v2865_v2  ;;  %v1390_v16 = vunpack.c.h.bf16 %v2865_v2 }
 0x1c6   : > { %v1362_v14 = vmul.bf16 1069105081, %v1317_v6  ;;  %v1365_v24 = vmul.bf16 1069105081, %v1318_v28  ;;  %v1429_v29 = vadd.f32 %v1388_v20, %v1387_v30  ;;  %v1432_v40 = vadd.f32 %v1390_v16, %v1389_v1 }
 0x1c8   : > { %2143 = vpow.bf16 %v1362_v14  ;;  %1430 = vadd.xlane.f32.xlu0 %v1429_v29  ;;  %1433 = vadd.xlane.f32.xlu1 %v1432_v40 }
 0x1c9   : > { %2145 = vpow.bf16 %v1365_v24 }
 0x1ca   : > { %v2871_v42 = vpop.eup %2139 }
 0x1cb   : > { %v2873_v45 = vpop.eup %2141  ;;  %v1391_v33 = vunpack.c.l.bf16 %v2871_v42  ;;  %v1393_v59 = vunpack.c.h.bf16 %v2871_v42 }
 0x1cc   : > { %v1392_v46 = vunpack.c.l.bf16 %v2873_v45  ;;  %v1394_v60 = vunpack.c.h.bf16 %v2873_v45 }
 0x1ce   : > { %v1435_v63 = vadd.f32 %v1392_v46, %v1391_v33  ;;  %v1438_v4 = vadd.f32 %v1394_v60, %v1393_v59 }
 0x1d0   : > { %1436 = vadd.xlane.f32.xlu0 %v1435_v63  ;;  %1439 = vadd.xlane.f32.xlu1 %v1438_v4  ;;  %v3097_v4 = vmul.bf16 %v2628_v31, %v2732_v19 }
 0x1d3   : > { %v2879_v21 = vpop.eup %2143 }
 0x1d4   : > { %v2881_v50 = vpop.eup %2145  ;;  %v1397_v53 = vunpack.c.h.bf16 %v2879_v21  ;;  %v1395_v58 = vunpack.c.l.bf16 %v2879_v21 }
 0x1d5   : > { %v1398_v56 = vunpack.c.h.bf16 %v2881_v50  ;;  %v1396_v6 = vunpack.c.l.bf16 %v2881_v50 }
 0x1d7   : > { %v1444_v28 = vadd.f32 %v1398_v56, %v1397_v53  ;;  %v1441_v30 = vadd.f32 %v1396_v6, %v1395_v58  ;;  %v3098_v58 = vld [vmem:[#allocation13_spill] sm:$0xff] }
 0x1d8   : > { %v3099_v56 = vmul.bf16 %v3098_v58, %v2722_v18 }
 0x1d9   : > { %1445 = vadd.xlane.f32.xlu1 %v1444_v28  ;;  %1442 = vadd.xlane.f32.xlu0 %v1441_v30 }
 0x22f   : > { %v1401_v1 = vpop.xlane.xlu0 %1400  ;;  %v1404_v20 = vpop.xlane.xlu1 %1403 }
 0x230   : > { %2147 = vrcp.f32 %v1401_v1  ;;  %v3100_v1 = vld [vmem:[#allocation14_spill] sm:$0xff] }
 0x231   : > { %2149 = vrcp.f32 %v1404_v20 }
 0x237   : > { %v1407_v16 = vpop.xlane.xlu0 %1406  ;;  %v1410_v14 = vpop.xlane.xlu1 %1409 }
 0x238   : > { %2151 = vrcp.f32 %v1407_v16  ;;  %v3102_v16 = vmul.bf16 %v2690_v34, %v2751_v13 }
 0x239   : > { %2153 = vrcp.f32 %v1410_v14 }
 0x23a   : > { %v2148_v24 = vpop.eup %2147 }
 0x23b   : > { %v2150_v29 = vpop.eup %2149 }
 0x23c   : > { %v1463_v40 = vpack.c.bf16 %v2150_v29, %v2148_v24 }
 0x23d   : > { %v1413_v33 = vpop.xlane.xlu0 %1412  ;;  %v1416_v59 = vpop.xlane.xlu1 %1415 }
 0x23e   : > { %2155 = vrcp.f32 %v1413_v33  ;;  %v1471_v46 = vmul.bf16 %v2803_v47, %v1463_v40  ;;  %v1472_v60 = vmul.bf16 %v2805_v49, %v1463_v40  ;;  %v3101_v47 = vmul.bf16 %v3100_v1, %v2732_v19  ;;  %v2059_v33 = vld [vmem:[%s3051_s6] sm:$0xff]   ;;  %v2061_v1 = vld [vmem:[%s3051_s6 + $0x10] sm:$0xff]  }
 0x23f   : > { %2157 = vrcp.f32 %v1416_v59  ;;  %v2246_v40 = vmov 0.0  }
 0x240   : > { %1519 = vmatprep.mubr.bf16.mxu1 %v1472_v60  ;;  %1965 = vmatprep.subr.bf16.mxu0 %v2246_v40 }
 0x241   : > { %1520 = vmatmul.mubr.bf16.vlgmr.msra.gmra.mrb[32].mxu1 %v1471_v46  ;;  %1981 = vmatprep.mubr.msk.bf16.mxu0 %vm2247_vm2, %v2246_v40 }
 0x242   : > { %v2152_v63 = vpop.eup %2151  ;;  %1695 = vmatpush1.bf16.msra.mxu1 %v3097_v4  ;;  %v2060_v4 = vld [vmem:[%s3051_s6 + $0x8] sm:$0xff]  }
 0x243   : > { %v2154_v53 = vpop.eup %2153  ;;  %1696 = vmatprep.subr.bf16.mxu1 %v3099_v56 }
 0x244   : > { %v1464_v6 = vpack.c.bf16 %v2154_v53, %v2152_v63 }
 0x245   : > { %v1419_v28 = vpop.xlane.xlu0 %1418  ;;  %v1422_v30 = vpop.xlane.xlu1 %1421 }
 0x246   : > { %1697 = vmatpush1.bf16.msra.mxu1 %v3101_v47  ;;  %2159 = vrcp.f32 %v1419_v28  ;;  %v1474_v49 = vmul.bf16 %v2817_v15, %v1464_v6  ;;  %v1473_v20 = vmul.bf16 %v2815_v35, %v1464_v6 }
 0x247   : > { %2161 = vrcp.f32 %v1422_v30  ;;  %1698 = vmatprep.subr.bf16.mxu1 %v1212_v11 }
 0x248   : > { %v2156_v31 = vpop.eup %2155  ;;  %1527 = vmatprep.mubr.bf16.mxu1 %v1474_v49 }
 0x249   : > { %v2158_v18 = vpop.eup %2157  ;;  %1528 = vmatmul.mubr.bf16.gmra.mrb[36].mxu1 %v1473_v20 }
 0x24a   : > { %1699 = vmatpush1.bf16.msra.mxu1 %v1211_v8  ;;  %v1465_v19 = vpack.c.bf16 %v2158_v18, %v2156_v31 }
 0x24b   : > { %1700 = vmatprep.subr.bf16.mxu1 %v3102_v16  ;;  %v2062_v16 = vld [vmem:[%s3051_s6 + $0x18] sm:$0xff]  }
 0x24c   : > { %v1476_v35 = vmul.bf16 %v2829_v36, %v1465_v19  ;;  %v1475_v55 = vmul.bf16 %v2827_v57, %v1465_v19 }
 0x24d   : > { %v1425_v15 = vpop.xlane.xlu0 %1424  ;;  %v1428_v14 = vpop.xlane.xlu1 %1427 }
 0x24e   : > { %1701 = vmatpush1.bf16.msra.mxu1 %v3103_v12  ;;  %2163 = vrcp.f32 %v1425_v15  ;;  %1535 = vmatprep.mubr.bf16.mxu1 %v1476_v35 }
 0x24f   : > { %2165 = vrcp.f32 %v1428_v14  ;;  %1702 = vmatprep.subr.bf16.mxu1 %v1216_v5 }
 0x250   : > { %v2160_v11 = vpop.eup %2159 }
 0x251   : > { %v2162_v34 = vpop.eup %2161  ;;  %1536 = vmatmul.mubr.bf16.gmra.mrb[40].mxu1 %v1475_v55 }
 0x252   : > { %1703 = vmatpush1.bf16.msra.mxu1 %v1215_v3  ;;  %v1466_v13 = vpack.c.bf16 %v2162_v34, %v2160_v11  ;;  %v2063_v34 = vld [vmem:[%s3051_s6 + $0x20] sm:$0xff]  }
 0x253   : > { %1704 = vmatprep.subr.bf16.mxu1 %v1218_v27 }
 0x254   : > { %v1478_v0 = vmul.bf16 %v2841_v23, %v1466_v13  ;;  %v1477_v62 = vmul.bf16 %v2839_v17, %v1466_v13 }
 0x255   : > { %v1431_v22 = vpop.xlane.xlu0 %1430  ;;  %v1434_v8 = vpop.xlane.xlu1 %1433 }
 0x256   : > { %1705 = vmatpush1.bf16.msra.mxu1 %v1217_v61  ;;  %2167 = vrcp.f32 %v1431_v22  ;;  %1543 = vmatprep.mubr.bf16.mxu1 %v1478_v0 }
 0x257   : > { %2169 = vrcp.f32 %v1434_v8  ;;  %1706 = vmatprep.subr.bf16.mxu1 %v1220_v51 }
 0x258   : > { %v2164_v9 = vpop.eup %2163 }
 0x259   : > { %v2166_v39 = vpop.eup %2165  ;;  %1544 = vmatmul.mubr.bf16.gmra.mrb[44].mxu1 %v1477_v62 }
 0x25a   : > { %1707 = vmatpush1.bf16.msra.mxu1 %v1219_v41  ;;  %v1467_v43 = vpack.c.bf16 %v2166_v39, %v2164_v9  ;;  %v2064_v39 = vld [vmem:[%s3051_s6 + $0x28] sm:$0xff]  }
 0x25b   : > { %1708 = vmatprep.subr.bf16.mxu1 %v3104_v44 }
 0x25c   : > { %v1480_v7 = vmul.bf16 %v2853_v32, %v1467_v43  ;;  %v1479_v27 = vmul.bf16 %v2851_v10, %v1467_v43 }
 0x25d   : > { %v1437_v5 = vpop.xlane.xlu0 %1436  ;;  %v1440_v3 = vpop.xlane.xlu1 %1439 }
 0x25e   : > { %1709 = vmatpush1.bf16.msra.mxu1 %v3105_v54  ;;  %2171 = vrcp.f32 %v1437_v5  ;;  %1551 = vmatprep.mubr.bf16.mxu1 %v1480_v7 }
 0x25f   : > { %2173 = vrcp.f32 %v1440_v3 }
 0x260   : > { %v2168_v52 = vpop.eup %2167 }
 0x261   : > { %v2170_v61 = vpop.eup %2169  ;;  %1552 = vmatmul.mubr.bf16.gmra.mrb[48].mxu1 %v1479_v27  ;;  %v2065_v27 = vld [vmem:[%s3051_s6 + $0x30] sm:$0xff]  }
 0x262   : > { %v1468_v51 = vpack.c.bf16 %v2170_v61, %v2168_v52 }
 0x264   : > { %v1482_v37 = vmul.bf16 %v2865_v2, %v1468_v51  ;;  %v1481_v57 = vmul.bf16 %v2863_v38, %v1468_v51  ;;  %v3106_v38 = vmov 0  }
 0x266   : > { %v1443_v25 = vpop.xlane.xlu0 %1442  ;;  %v1446_v41 = vpop.xlane.xlu1 %1445  ;;  %1559 = vmatprep.mubr.bf16.mxu1 %v1482_v37 }
 0x267   : > { %2175 = vrcp.f32 %v1443_v25 }
 0x268   : > { %2177 = vrcp.f32 %v1446_v41  ;;  %v2172_v26 = vpop.eup %2171 }
 0x269   : > { %v2174_v48 = vpop.eup %2173  ;;  %1560 = vmatmul.mubr.bf16.gmra.mrb[52].mxu1 %v1481_v57  ;;  %v2066_v57 = vld [vmem:[%s3051_s6 + $0x38] sm:$0xff]  }
 0x26a   : > { %v1469_v36 = vpack.c.bf16 %v2174_v48, %v2172_v26 }
 0x26c   : > { %v1484_v17 = vmul.bf16 %v2873_v45, %v1469_v36  ;;  %v1483_v23 = vmul.bf16 %v2871_v42, %v1469_v36 }
 0x26e   : > { %1567 = vmatprep.mubr.bf16.mxu1 %v1484_v17 }
 0x271   : > { %v2176_v10 = vpop.eup %2175  ;;  %1568 = vmatmul.mubr.bf16.gmra.mrb[56].mxu1 %v1483_v23  ;;  %v326_v23 = vld [vmem:[%s3047_s2] sm:$0x3] }
 0x272   : > { %v2178_v32 = vpop.eup %2177 }
 0x273   : > { %v1470_v2 = vpack.c.bf16 %v2178_v32, %v2176_v10  ;;  %v343_v10 = vld [vmem:[%s3048_s3] sm:$0xf] }
 0x274   : > { %1691 = vperm.xlu0 %2033, %v343_v10  }
 0x275   : > { %v1486_v24 = vmul.bf16 %v2881_v50, %v1470_v2  ;;  %v1485_v29 = vmul.bf16 %v2879_v21, %v1470_v2 }
 0x277   : > { %1575 = vmatprep.mubr.bf16.mxu1 %v1486_v24 }
 0x279   : > { %1576 = vmatmul.mubr.bf16.gmra.mrb[60].mxu1 %v1485_v29 }
 0x27a   : > { %1726 = vmatprep.mubr.bf16.mxu1 %v3106_v38 }
 0x314   : > { %v1521_v45 = vpop.f32.mrb[32].mxu1 }
 0x315   : > { %v1523_v42 = vpop.f32.mrb[33].mxu1 }
 0x316   : > { %v1524_v59 = vpop.f32.mrb[34].mxu1 }
 0x317   : > { %v1584_v50 = vpack.c.bf16 %v1524_v59, %v1521_v45  ;;  %v1526_v46 = vpop.f32.mrb[35].mxu1 }
 0x319   : > { %v1640_v60 = vmul.bf16 %v2059_v33, %v1584_v50 }
 0x31b   : > { %1966 = vmatpush3.bf16.xpose.msra.mxu0 %v1640_v60 }
 0x31c   : > { %v1529_v21 = vpop.f32.mrb[36].mxu1  ;;  %1967 = vmatprep.subr.bf16.mxu0 %v2246_v40 }
 0x31d   : > { %v1531_v63 = vpop.f32.mrb[37].mxu1 }
 0x31e   : > { %v1532_v53 = vpop.f32.mrb[38].mxu1 }
 0x31f   : > { %v1585_v58 = vpack.c.bf16 %v1532_v53, %v1529_v21  ;;  %v1534_v56 = vpop.f32.mrb[39].mxu1 }
 0x321   : > { %v1641_v6 = vmul.bf16 %v2060_v4, %v1585_v58 }
 0x323   : > { %1968 = vmatpush3.bf16.xpose.msra.mxu0 %v1641_v6 }
 0x324   : > { %v1537_v28 = vpop.f32.mrb[40].mxu1  ;;  %1969 = vmatprep.subr.bf16.mxu0 %v2246_v40 }
 0x325   : > { %v1539_v30 = vpop.f32.mrb[41].mxu1 }
 0x326   : > { %v1540_v47 = vpop.f32.mrb[42].mxu1 }
 0x327   : > { %v1586_v49 = vpack.c.bf16 %v1540_v47, %v1537_v28  ;;  %v1542_v20 = vpop.f32.mrb[43].mxu1 }
 0x329   : > { %v1642_v31 = vmul.bf16 %v2061_v1, %v1586_v49 }
 0x32b   : > { %1970 = vmatpush3.bf16.xpose.msra.mxu0 %v1642_v31 }
 0x32c   : > { %v1545_v18 = vpop.f32.mrb[44].mxu1  ;;  %1971 = vmatprep.subr.bf16.mxu0 %v2246_v40 }
 0x32d   : > { %v1547_v19 = vpop.f32.mrb[45].mxu1 }
 0x32e   : > { %v1548_v35 = vpop.f32.mrb[46].mxu1 }
 0x32f   : > { %v1587_v15 = vpack.c.bf16 %v1548_v35, %v1545_v18  ;;  %v1550_v14 = vpop.f32.mrb[47].mxu1  ;;  %v344_v35 = vld [vmem:[%s3049_s4] sm:$0xf] }
 0x331   : > { %v1643_v12 = vmul.bf16 %v2062_v16, %v1587_v15  ;;  %v345_v15 = vld [vmem:[%s3050_s5] sm:$0xf] }
 0x333   : > { %1972 = vmatpush3.bf16.xpose.msra.mxu0 %v1643_v12 }
 0x334   : > { %v1553_v55 = vpop.f32.mrb[48].mxu1  ;;  %1973 = vmatprep.subr.bf16.mxu0 %v2246_v40 }
 0x335   : > { %v1555_v11 = vpop.f32.mrb[49].mxu1 }
 0x336   : > { %v1556_v13 = vpop.f32.mrb[50].mxu1 }
 0x337   : > { %v1588_v0 = vpack.c.bf16 %v1556_v13, %v1553_v55  ;;  %v1558_v22 = vpop.f32.mrb[51].mxu1 }
 0x339   : > { %v1644_v8 = vmul.bf16 %v2063_v34, %v1588_v0 }
 0x33b   : > { %1974 = vmatpush3.bf16.xpose.msra.mxu0 %v1644_v8 }
 0x33c   : > { %v1561_v62 = vpop.f32.mrb[52].mxu1  ;;  %1975 = vmatprep.subr.bf16.mxu0 %v2246_v40 }
 0x33d   : > { %v1563_v9 = vpop.f32.mrb[53].mxu1 }
 0x33e   : > { %v1564_v43 = vpop.f32.mrb[54].mxu1 }
 0x33f   : > { %v1589_v44 = vpack.c.bf16 %v1564_v43, %v1561_v62  ;;  %v1566_v7 = vpop.f32.mrb[55].mxu1 }
 0x341   : > { %v1645_v5 = vmul.bf16 %v2064_v39, %v1589_v44 }
 0x343   : > { %1976 = vmatpush3.bf16.xpose.msra.mxu0 %v1645_v5 }
 0x344   : > { %v1569_v3 = vpop.f32.mrb[56].mxu1  ;;  %1977 = vmatprep.subr.bf16.mxu0 %v2246_v40 }
 0x345   : > { %v1571_v54 = vpop.f32.mrb[57].mxu1 }
 0x346   : > { %v1572_v52 = vpop.f32.mrb[58].mxu1 }
 0x347   : > { %v1590_v61 = vpack.c.bf16 %v1572_v52, %v1569_v3  ;;  %v1574_v51 = vpop.f32.mrb[59].mxu1 }
 0x349   : > { %v1646_v37 = vmul.bf16 %v2065_v27, %v1590_v61 }
 0x34b   : > { %1978 = vmatpush3.bf16.xpose.msra.mxu0 %v1646_v37 }
 0x34c   : > { %v1577_v25 = vpop.f32.mrb[60].mxu1  ;;  %1979 = vmatprep.subr.bf16.mxu0 %v2246_v40  ;;  %v1692_v40 = vpop.permute.xlu0 %1691 }
 0x34d   : > { %v1579_v41 = vpop.f32.mrb[61].mxu1 }
 0x34e   : > { %v1580_v26 = vpop.f32.mrb[62].mxu1 }
 0x34f   : > { %v1591_v48 = vpack.c.bf16 %v1580_v26, %v1577_v25  ;;  %v1582_v36 = vpop.f32.mrb[63].mxu1 }
 0x351   : > { %v1647_v17 = vmul.bf16 %v2066_v57, %v1591_v48 }
 0x353   : > { %1980 = vmatpush3.bf16.xpose.msra.mxu0 %v1647_v17 }
 0x35a   : > { %1982 = vmatmul.mubr.bf16.vlgmr.msra.gmra.mrb[64].mxu0 %v326_v23 }
 0x42d   : > { %v1682_v32 = vpop.f32.mrb[64].mxu0 }
 0x42e   : > { %v1688_v2 = vpack.c.bf16 %v1682_v32, %v1682_v32  ;;  %v1983_v24 = vpop.f32.mrb[65].mxu0 }
 0x42f   : > { %v1685_v29 = vpop.f32.mrb[66].mxu0 }
 0x430   : > { %v1984_v38 = vpop.f32.mrb[67].mxu0  ;;  %1727 = vmatmul.mubr.bf16.vlgmr.msra.gmra.mrb[64].mxu1 %v1688_v2 }
 0x503   : > { %v1728_v45 = vpop.f32.mrb[64].mxu1 }
 0x504   : > { %v1729_v42 = vadd.f32 %v1728_v45, %v1692_v40  ;;  %v1730_v33 = vpop.f32.mrb[65].mxu1 }
 0x505   : > { %v1731_v59 = vadd.f32 %v1730_v33, %v1692_v40  ;;  %v1732_v50 = vpop.f32.mrb[66].mxu1 }
 0x506   : > { %v1733_v46 = vpop.f32.mrb[67].mxu1  ;;  %v1736_v60 = vsel %vm1735_vm3, %v1729_v42, 0.0 }
 0x507   : > { %v1737_v21 = vsel %vm1735_vm3, %v1731_v59, 0.0 }
 0x508   : > { %v1738_v63 = vadd.f32 %v1737_v21, %v1736_v60 }
 0x50a   : > { %1739 = vadd.xlane.f32.xlu1 %v1738_v63 }
 0x597   : > { %v1740_v4 = vpop.xlane.xlu1 %1739 }
 0x598   : > { %v1741_v53 = vrot.slane %v1740_v4, 4 }
 0x59a   : > { %v1742_v58 = vadd.f32 %v1741_v53, %v1740_v4 }
 0x59c   : > { %v1743_v56 = vrot.slane %v1742_v58, 2 }
 0x59e   : > { %v1744_v6 = vadd.f32 %v1743_v56, %v1742_v58 }
 0x5a0   : > { %v1745_v28 = vrot.slane %v1744_v6, 1 }
 0x5a2   : > { %v1746_v30 = vadd.f32 %v1745_v28, %v1744_v6 }
 0x5a4   : > { %1985 = vpush %v1746_v30 }
 0x5d5   : > { %s1986_s16 = spop %1985 }
 0x5d6   : > { %s1750_s17 = smul.f32 0.0009765625, %s1986_s16  ;;  %s1821_s16 = sshll.u32 %s271_s15, 4  ;;  %s3005_s16 = int_to_ptr.vmem [resolvable:$true] %s1821_s16 }
 0x5d7   : > { %s2181_s21 = scalar_lea.vmem %s3005_s16, 64 }
 0x5d8   : > { %v1751_v1 = vstv %s1750_s17  ;;  %p2182_p11 = scmp.ne.s32.totalorder %s3005_s16, %s2181_s21 }
 0x5d9   : > { %v1752_v47 = vsub.f32 %v1729_v42, %v1751_v1  ;;  %v1753_v49 = vsub.f32 %v1731_v59, %v1751_v1 }
 0x5da   : > { %p2183_p12 = pnand %p2182_p11, %p2327_p5 }
 0x5db   : > { %v1754_v20 = vmul.f32 %v1752_v47, %v1752_v47  ;;  %v1755_v31 = vmul.f32 %v1753_v49, %v1753_v49 }
 0x5dc   : > { %p2184_p13 = pneg %p2183_p12 }
 0x5dd   : > { %v1756_v18 = vsel %vm1735_vm3, %v1754_v20, 0.0  ;;  %v1757_v19 = vsel %vm1735_vm3, %v1755_v31, 0.0 }
 0x5de   : > { %v1758_v16 = vadd.f32 %v1757_v19, %v1756_v18 }
 0x5e0   : > { %1759 = vadd.xlane.f32.xlu1 %v1758_v16 }
 0x5f1   : > { %1780 = vperm.xlu1 %2034, %v344_v35  }
 0x5f5   : > { %1787 = vperm.xlu1 %2034, %v345_v15  }
 0x66d   : > { %v1760_v14 = vpop.xlane.xlu1 %1759 }
 0x66e   : > { %v1761_v12 = vrot.slane %v1760_v14, 4 }
 0x670   : > { %v1762_v55 = vadd.f32 %v1761_v12, %v1760_v14 }
 0x671   : > { %v1781_v62 = vpop.permute.xlu1 %1780 }
 0x672   : > { %v1763_v11 = vrot.slane %v1762_v55, 2 }
 0x674   : > { %v1764_v34 = vadd.f32 %v1763_v11, %v1762_v55 }
 0x675   : > { %v1788_v5 = vpop.permute.xlu1 %1787 }
 0x676   : > { %v1765_v13 = vrot.slane %v1764_v34, 1 }
 0x678   : > { %v1766_v0 = vadd.f32 %v1765_v13, %v1764_v34 }
 0x67a   : > { %1987 = vpush %v1766_v0 }
 0x6ab   : > { %s1988_s22 = spop %1987 }
 0x6ac   : > { %s1770_s23 = smul.f32 0.0009765625, %s1988_s22  ;;  %s2185_s22 = sshll.u32 %s2248_s28, 4  ;;  %s2186_s22 = int_to_ptr.vmem [resolvable:$false] %s2185_s22 }
 0x6ad   : > { %p2188_p0 = scmp.lt.s32.totalorder %s3005_s16, %s2186_s22 }
 0x6ae   : > { %s1771_s29 = sadd.f32 1e-05, %s1770_s23  ;;  %s2187_s23 = scalar_lea.vmem %s2186_s22, 128 }
 0x6af   : > { %p2189_p1 = scmp.lt.s32.totalorder %s2187_s23, %s2181_s21 }
 0x6b0   : > { %v1772_v22 = vstv %s1771_s29 }
 0x6b1   : > { %2179 = vrsqrt.f32 %v1772_v22  ;;  %p2190_p2 = por %p2189_p1, %p2188_p0 }
 0x6b3   : > { %p2191_p3 = pnand %p2190_p2, %p2184_p13 }
 0x6bb   : > { %v2180_v8 = vpop.eup %2179 }
 0x6bc   : > { %1989 = vpush %v2180_v8 }
 0x6ed   : > { %s1990_s13 = spop %1989 }
 0x6ee   : > { %v1775_v9 = vstv %s1990_s13 }
 0x6ef   : > { %v1776_v39 = vmul.f32 %v1775_v9, %v1752_v47  ;;  %v1777_v43 = vmul.f32 %v1775_v9, %v1753_v49 }
 0x6f1   : > { %v1783_v44 = vmul.f32 %v1781_v62, %v1776_v39  ;;  %v1784_v7 = vmul.f32 %v1781_v62, %v1777_v43 }
 0x6f3   : > { %v1790_v3 = vadd.f32 %v1788_v5, %v1783_v44  ;;  %v1791_v54 = vadd.f32 %v1788_v5, %v1784_v7 }
 0x6f5   : > { %v1947_v27 = vpack.c.bf16 %v1791_v54, %v1790_v3 }
 0x6f7   : > { %1948 = vst.sshfl [vmem:[%s271_s15] sm:$0x33 pattern:$0x76325410] %v1947_v27 }
 0x6f8   : > { %2194 = shalt.err (!%p2191_p3)
}
 0x6f9   : > { %s2195_s29 = scalar_lea.hbm %s3003_s19, 64  ;;  %s2199_s13 = scalar_lea.hbm %s3052_s7, 128 }
 0x6fa   : > { %p2196_p4 = scmp.ne.s32.totalorder %s3003_s19, %s2195_s29  ;;  %p2200_p9 = scmp.lt.u32.totalorder %s3003_s19, %s3052_s7 }
 0x6fb   : > { %p2201_p10 = scmp.lt.u32.totalorder %s2199_s13, %s2195_s29  ;;  %p2203_p12 = scmp.lt.u32.totalorder %s2195_s29, %s3003_s19 }
 0x6fc   : > { %p2197_p7 = pnand %p2196_p4, %p2327_p5 }
 0x6fd   : > { %p2202_p11 = por %p2201_p10, %p2200_p9 }
 0x6fe   : > { %p2198_p8 = pneg %p2197_p7 }
 0x6ff   : > { %p2204_p13 = por %p2203_p12, %p2202_p11 }
 0x701   : > { %p2205_p0 = pnand %p2204_p13, %p2198_p8 }
 0x703   : > { %2208 = shalt.err (!%p2205_p0)
}
 0x704   : > { %1991 = dma.vmem_to_hbm [thread:$0]  (%p2327_p5), %s3005_s16, 64, %s3003_s19, %s1807_s20  }
 0x705 PF: > { %p1997_p1 = scmp.ge.s32.totalorder %s2243_s27, 2  ;;  %s1833_s17 = sand.u32 1, %s2231_s24  }
 0x706   : > { %s1834_s18 = scalar_lea.sflag [#allocation3], %s1833_s17 }
 0x707   : > { %p1994_p2 = pnand %p1997_p1, %p2331_p6 }
 0x709   : > { %2226 = dma.done.wait (!%p1994_p2), %s1834_s18, 64  }
 0x70a   : > { %2228 = vsyncadd (!%p1994_p2), %s1834_s18, 4294967232  ;;  %p17_p3 = scmp.ge.s32.totalorder %s2314_s30, 4   ;;  %s3107_s24 = smov %s2235_s25 }
 0x70b   : > { %s3108_s25 = smov %s2239_s26  ;;  %s3109_s26 = smov %s2325_s10 }
 0x70c   : > { %s3110_s27 = smov %s2314_s30  ;;  %19 = sbr.rel (!%p17_p3) target bundleno = 3 (0x3), region = 83 }
 0x713   :  { %1839 = vsyncpa [#allocation3], 1 }
 0x714   :  { %1841 = vsyncpa [#allocation3 + $0x1], 1 }

</bundles_post_ra>
